<compile_context>
chip_gen: v6e
topology: v6e:2x2x1
jax: 0.10.0
libtpu: 0.0.40
codegen_flags: <defaults>
</compile_context>

<pallas_src>
import functools

import jax
import jax.numpy as jnp
from jax.experimental import pallas as pl
from jax.experimental.pallas import tpu as pltpu

BN_EPS = 1e-5      # nn.BatchNorm1d default eps
NORM_EPS = 1e-12   # torch.nn.functional.normalize default eps


def _round_up(v, m):
    return (v + m - 1) // m * m


def _dual_head_kernel(x_ref, w1_ref, gamma_ref, beta_ref, w2_ref, b2_ref,
                      out_ref,
                      sum_ref, ssq_ref, scale_ref, shift_ref,
                      *, inv_n, pc_pad):
    phase = pl.program_id(0)          # 0: BN statistics sweep, 1: apply + heads
    tile = pl.program_id(1)
    n_tiles = pl.num_programs(1)

    # Layer 1 on the MXU: cast the f32 tile to bf16 in-kernel (VPU op hidden under the
    # matmul); one fused (F, Hc+Hp) RHS so x streams through the MXU once per phase.
    x = x_ref[...].astype(jnp.bfloat16)                                    # (T, F)
    h = jnp.dot(x, w1_ref[...], preferred_element_type=jnp.float32)       # (T, Hc+Hp) f32

    @pl.when(phase == 0)
    def _stats():
        @pl.when(tile == 0)
        def _():
            sum_ref[...] = jnp.zeros_like(sum_ref)
            ssq_ref[...] = jnp.zeros_like(ssq_ref)

        sum_ref[...] += jnp.sum(h, axis=0, keepdims=True)
        ssq_ref[...] += jnp.sum(h * h, axis=0, keepdims=True)

        @pl.when(tile == n_tiles - 1)
        def _():
            # Train-mode BatchNorm1d (biased batch variance), single-sweep form,
            # normalized by the TRUE batch size (zero-padded rows contribute 0 to
            # both sums, so padding does not bias the stats).
            mean = sum_ref[...] * inv_n
            var = ssq_ref[...] * inv_n - mean * mean
            scale_ref[...] = gamma_ref[...] * jax.lax.rsqrt(var + BN_EPS)
            shift_ref[...] = beta_ref[...] - mean * scale_ref[...]

    @pl.when(phase == 1)
    def _apply():
        hb = jnp.maximum(h * scale_ref[...] + shift_ref[...], 0.0).astype(jnp.bfloat16)
        # Block-diagonal second layer: one MXU pass produces the packed
        # [logits | projector-features] slab; padded lanes are exact zeros.
        out = jnp.dot(hb, w2_ref[...], preferred_element_type=jnp.float32) + b2_ref[...]
        logits = out[:, :pc_pad]
        feat = out[:, pc_pad:]
        # L2-normalize the projector part (zero padding lanes contribute nothing).
        ssq = jnp.sum(feat * feat, axis=-1, keepdims=True)
        feat = feat * jax.lax.rsqrt(jnp.maximum(ssq, NORM_EPS * NORM_EPS))
        out_ref[...] = jnp.concatenate([logits, feat], axis=-1).astype(out_ref.dtype)


def prepare_dual_head_params(params, num_classes, proj_dim):
    """One-time weight prep (hoisted out of the per-call path).

    PyTorch-layout params -> fused kernel operands:
      w1 : (F, Hc+Hp) bf16   concatenated first-layer weights (bias dropped: cancels
                             under train-mode BatchNorm)
      gamma/beta : (1, Hc+Hp) f32 concatenated BN affine params
      w2 : (Hc+Hp, PC+PP) bf16 block-diagonal, zero-padded to lane-dense widths
      b2 : (1, PC+PP) f32 packed/padded second-layer bias
    """
    pc, pp = params["classifier"], params["projector"]
    w1c = jnp.asarray(pc["w1"], jnp.float32).T                     # (F, Hc)
    w1p = jnp.asarray(pp["w1"], jnp.float32).T                     # (F, Hp)
    hc, hp = w1c.shape[1], w1p.shape[1]
    pc_pad = _round_up(num_classes, 128)
    pp_pad = _round_up(proj_dim, 128)

    w1 = jnp.concatenate([w1c, w1p], axis=1).astype(jnp.bfloat16)  # (F, Hc+Hp)
    gamma = jnp.concatenate(
        [jnp.asarray(pc["gamma"], jnp.float32), jnp.asarray(pp["gamma"], jnp.float32)]
    ).reshape(1, -1)
    beta = jnp.concatenate(
        [jnp.asarray(pc["beta"], jnp.float32), jnp.asarray(pp["beta"], jnp.float32)]
    ).reshape(1, -1)

    w2 = jnp.zeros((hc + hp, pc_pad + pp_pad), jnp.float32)
    w2 = w2.at[:hc, :num_classes].set(jnp.asarray(pc["w2"], jnp.float32).T)
    w2 = w2.at[hc:, pc_pad:pc_pad + proj_dim].set(jnp.asarray(pp["w2"], jnp.float32).T)
    w2 = w2.astype(jnp.bfloat16)

    b2 = jnp.zeros((1, pc_pad + pp_pad), jnp.float32)
    b2 = b2.at[:, :num_classes].set(jnp.asarray(pc["b2"], jnp.float32).reshape(1, -1))
    b2 = b2.at[:, pc_pad:pc_pad + proj_dim].set(
        jnp.asarray(pp["b2"], jnp.float32).reshape(1, -1))

    ops = tuple(jax.device_put(o) for o in (w1, gamma, beta, w2, b2))
    meta = dict(num_classes=num_classes, proj_dim=proj_dim,
                pc_pad=pc_pad, pp_pad=pp_pad, h_tot=hc + hp)
    return ops, meta


def dual_head_forward(fea, ops, meta, *, tile_n=512):
    """Pallas forward of DualHeadModel's two heads. fea: (N, F) float32."""
    n, f = fea.shape
    h_tot, pc_pad, pp_pad = meta["h_tot"], meta["pc_pad"], meta["pp_pad"]
    out_pad = pc_pad + pp_pad

    tile = min(tile_n, _round_up(n, 8))
    n_pad = _round_up(n, tile)
    if n_pad != n:
        # Zero rows: contribute 0 to BN sums (normalized by true n), sliced off below.
        fea = jnp.pad(fea, ((0, n_pad - n), (0, 0)))
    n_tiles = n_pad // tile

    kernel = functools.partial(_dual_head_kernel, inv_n=1.0 / n, pc_pad=pc_pad)

    flops = 2 * (2 * n_pad * f * h_tot) + 2 * n_pad * h_tot * out_pad
    bytes_accessed = (2 * n_pad * f * 4                 # x (f32) read in both phases
                      + 2 * f * h_tot                   # w1 (bf16)
                      + 2 * h_tot * out_pad             # w2 (bf16)
                      + 4 * (2 * h_tot + out_pad)       # gamma, beta, b2 (f32)
                      + n_pad * out_pad * 4)            # packed output slab

    out = pl.pallas_call(
        kernel,
        out_shape=jax.ShapeDtypeStruct((n_pad, out_pad), jnp.float32),
        grid_spec=pltpu.PrefetchScalarGridSpec(
            num_scalar_prefetch=0,
            grid=(2, n_tiles),                          # (phase, N tile); phase outermost
            in_specs=[
                pl.BlockSpec((tile, f), lambda p, t: (t, 0)),        # fea tile
                pl.BlockSpec((f, h_tot), lambda p, t: (0, 0)),       # fused w1 (resident)
                pl.BlockSpec((1, h_tot), lambda p, t: (0, 0)),       # gamma
                pl.BlockSpec((1, h_tot), lambda p, t: (0, 0)),       # beta
                pl.BlockSpec((h_tot, out_pad), lambda p, t: (0, 0)), # block-diag w2
                pl.BlockSpec((1, out_pad), lambda p, t: (0, 0)),     # packed b2
            ],
            # Phase 0 never writes output -> park it on block 0; phase 1 walks tiles.
            out_specs=pl.BlockSpec((tile, out_pad), lambda p, t: (p * t, 0)),
            scratch_shapes=[pltpu.VMEM((1, h_tot), jnp.float32)] * 4,  # sum, sumsq, scale, shift
        ),
        compiler_params=pltpu.CompilerParams(
            dimension_semantics=("arbitrary", "arbitrary"),
            vmem_limit_bytes=32 * 1024 * 1024,
        ),
        cost_estimate=pl.CostEstimate(flops=flops,
                                      transcendentals=h_tot + n_pad,
                                      bytes_accessed=bytes_accessed),
    )(fea, *ops)

    logits = out[:n, :meta["num_classes"]]
    feat = out[:n, pc_pad:pc_pad + meta["proj_dim"]]
    return logits, feat


def reference_forward(fea, params):
    """Pure-JAX reference following the PyTorch module (same bf16-MXU / f32-acc precision)."""
    x = fea.astype(jnp.bfloat16)

    def mlp_head(p):
        h = jnp.dot(x, jnp.asarray(p["w1"]).T.astype(jnp.bfloat16),
                    preferred_element_type=jnp.float32)
        h = h + p["b1"].reshape(1, -1)           # kept here: cancels under train-mode BN
        mean = jnp.mean(h, axis=0, keepdims=True)
        var = jnp.mean((h - mean) ** 2, axis=0, keepdims=True)
        h = (h - mean) / jnp.sqrt(var + BN_EPS) * p["gamma"].reshape(1, -1) \
            + p["beta"].reshape(1, -1)
        h = jnp.maximum(h, 0.0).astype(jnp.bfloat16)
        return jnp.dot(h, jnp.asarray(p["w2"]).T.astype(jnp.bfloat16),
                       preferred_element_type=jnp.float32) + p["b2"].reshape(1, -1)

    logits = mlp_head(params["classifier"])
    feat = mlp_head(params["projector"])
    norm = jnp.maximum(jnp.linalg.norm(feat, axis=1, keepdims=True), NORM_EPS)
    return logits, feat / norm


if __name__ == "__main__":
    # Small shapes consistent with DualHeadModel(arch='cnn'):
    #   encoder feature dim F = 256 (CNN classifier.in_features),
    #   classifier = MLPHead(F, mlp_hidden=2, num_classes) -> hidden 512,
    #   projector  = MLPHead(F, 1, feature_dim)            -> hidden 256.
    N, F = 8, 256
    NUM_CLASSES = 10
    PROJ_DIM = 128
    MLP_HIDDEN = 2

    key = jax.random.PRNGKey(0)
    k_fea, k_cls, k_prj = jax.random.split(key, 3)
    fea = jax.random.normal(k_fea, (N, F), jnp.float32)

    def make_head_params(k, in_dim, scale_factor, out_dim):
        h_dim = round(scale_factor * in_dim)
        kw1, kb1, kg, kb, kw2, kb2 = jax.random.split(k, 6)
        return {
            # PyTorch nn.Linear layout (out, in); He (kaiming-normal) weights.
            "w1": jax.random.normal(kw1, (h_dim, in_dim), jnp.float32) * jnp.sqrt(2.0 / in_dim),
            "b1": 0.1 * jax.random.normal(kb1, (h_dim,), jnp.float32),
            # BatchNorm1d affine params (perturbed from 1/0 to exercise the affine path).
            "gamma": 1.0 + 0.1 * jax.random.normal(kg, (h_dim,), jnp.float32),
            "beta": 0.1 * jax.random.normal(kb, (h_dim,), jnp.float32),
            "w2": jax.random.normal(kw2, (out_dim, h_dim), jnp.float32) * jnp.sqrt(2.0 / h_dim),
            "b2": 0.05 * jax.random.normal(kb2, (out_dim,), jnp.float32),
        }

    params = {
        "classifier": make_head_params(k_cls, F, MLP_HIDDEN, NUM_CLASSES),
        "projector": make_head_params(k_prj, F, 1, PROJ_DIM),
    }

    # One-time weight prep (amortized across forward calls).
    ops, meta = prepare_dual_head_params(params, NUM_CLASSES, PROJ_DIM)

    logits, feat_n = dual_head_forward(fea, ops, meta)
    logits = jax.block_until_ready(logits)
    feat_n = jax.block_until_ready(feat_n)

    ref_logits, ref_feat = reference_forward(fea, params)

    assert logits.shape == (N, NUM_CLASSES)
    assert feat_n.shape == (N, PROJ_DIM)
    err_l = float(jnp.max(jnp.abs(logits - ref_logits)))
    err_f = float(jnp.max(jnp.abs(feat_n - ref_feat)))
    assert jnp.allclose(logits, ref_logits, atol=1e-2, rtol=1e-2), f"logits max err {err_l}"
    assert jnp.allclose(feat_n, ref_feat, atol=1e-2, rtol=1e-2), f"feat max err {err_f}"
    assert jnp.allclose(jnp.linalg.norm(feat_n, axis=1), 1.0, atol=1e-3), "feat not unit-norm"

    print("KERNEL_OK")
</pallas_src>

<mosaic_0001>
module attributes {stable_mosaic.version = 11 : i64} {
  func.func @_dual_head_kernel(%arg0: i32, %arg1: i32, %arg2: memref<8x256xf32, #tpu.memory_space<vmem>>, %arg3: memref<256x768xbf16, #tpu.memory_space<vmem>>, %arg4: memref<1x768xf32, #tpu.memory_space<vmem>>, %arg5: memref<1x768xf32, #tpu.memory_space<vmem>>, %arg6: memref<768x256xbf16, #tpu.memory_space<vmem>>, %arg7: memref<1x256xf32, #tpu.memory_space<vmem>>, %arg8: memref<8x256xf32, #tpu.memory_space<vmem>>, %arg9: memref<1x768xf32, #tpu.memory_space<vmem>>, %arg10: memref<1x768xf32, #tpu.memory_space<vmem>>, %arg11: memref<1x768xf32, #tpu.memory_space<vmem>>, %arg12: memref<1x768xf32, #tpu.memory_space<vmem>>) attributes {dimension_semantics = [#tpu.dimension_semantics<arbitrary>, #tpu.dimension_semantics<arbitrary>], iteration_bounds = array<i64: 2, 1>, scalar_prefetch = 0 : i64, scratch_operands = 4 : i64, tpu.core_type = #tpu.core_type<tc>, window_params = [{transform_indices = @transform_0, window_bounds = array<i64: 8, 256>}, {pipeline_mode = #tpu.pipeline_mode<synchronous>, transform_indices = @transform_1, window_bounds = array<i64: 256, 768>}, {pipeline_mode = #tpu.pipeline_mode<synchronous>, transform_indices = @transform_2, window_bounds = array<i64: 1, 768>}, {pipeline_mode = #tpu.pipeline_mode<synchronous>, transform_indices = @transform_3, window_bounds = array<i64: 1, 768>}, {pipeline_mode = #tpu.pipeline_mode<synchronous>, transform_indices = @transform_4, window_bounds = array<i64: 768, 256>}, {pipeline_mode = #tpu.pipeline_mode<synchronous>, transform_indices = @transform_5, window_bounds = array<i64: 1, 256>}, {transform_indices = @transform_6, window_bounds = array<i64: 8, 256>}]} {
    %c0 = arith.constant 0 : index
    %c0_0 = arith.constant 0 : index
    %0 = vector.load %arg2[%c0, %c0_0] : memref<8x256xf32, #tpu.memory_space<vmem>>, vector<8x256xf32>
    %1 = arith.truncf %0 : vector<8x256xf32> to vector<8x256xbf16>
    %c0_1 = arith.constant 0 : index
    %c0_2 = arith.constant 0 : index
    %2 = vector.load %arg3[%c0_1, %c0_2] : memref<256x768xbf16, #tpu.memory_space<vmem>>, vector<256x768xbf16>
    %cst = arith.constant dense<0.000000e+00> : vector<8x768xf32>
    %3 = tpu.matmul %1, %2, %cst {dimension_numbers = #tpu.dot_dimension_numbers<[1], [0], [0], [1], [0, 0, 1, 1], [], []>} : vector<8x256xbf16>, vector<256x768xbf16>, vector<8x768xf32> -> vector<8x768xf32>
    %c0_i32 = arith.constant 0 : i32
    %4 = arith.cmpi eq, %arg0, %c0_i32 : i32
    %5 = arith.extui %4 : i1 to i32
    %c0_i32_3 = arith.constant 0 : i32
    %6 = arith.cmpi ne, %5, %c0_i32_3 : i32
    scf.if %6 {
      %c0_i32_5 = arith.constant 0 : i32
      %10 = arith.cmpi eq, %arg1, %c0_i32_5 : i32
      %11 = arith.extui %10 : i1 to i32
      %c0_i32_6 = arith.constant 0 : i32
      %12 = arith.cmpi ne, %11, %c0_i32_6 : i32
      scf.if %12 {
        %cst_19 = arith.constant 0.000000e+00 : f32
        %27 = vector.broadcast %cst_19 : f32 to vector<1x768xf32>
        %c0_20 = arith.constant 0 : index
        %c0_21 = arith.constant 0 : index
        %28 = vector.load %arg9[%c0_20, %c0_21] : memref<1x768xf32, #tpu.memory_space<vmem>>, vector<1x768xf32>
        tpu.vector_store %arg9[%c0_20, %c0_21], %27 {strides = array<i32>} : memref<1x768xf32, #tpu.memory_space<vmem>>, vector<1x768xf32>,
        %cst_22 = arith.constant 0.000000e+00 : f32
        %29 = vector.broadcast %cst_22 : f32 to vector<1x768xf32>
        %c0_23 = arith.constant 0 : index
        %c0_24 = arith.constant 0 : index
        %30 = vector.load %arg10[%c0_23, %c0_24] : memref<1x768xf32, #tpu.memory_space<vmem>>, vector<1x768xf32>
        tpu.vector_store %arg10[%c0_23, %c0_24], %29 {strides = array<i32>} : memref<1x768xf32, #tpu.memory_space<vmem>>, vector<1x768xf32>,
      } else {
      }
      %c0_7 = arith.constant 0 : index
      %c0_8 = arith.constant 0 : index
      %13 = vector.load %arg9[%c0_7, %c0_8] : memref<1x768xf32, #tpu.memory_space<vmem>>, vector<1x768xf32>
      %cst_9 = arith.constant dense<0.000000e+00> : vector<768xf32>
      %14 = vector.multi_reduction <add>, %3, %cst_9 [0] : vector<8x768xf32> to vector<768xf32>
      %15 = vector.shape_cast %14 : vector<768xf32> to vector<1x768xf32>
      %16 = arith.addf %13, %15 : vector<1x768xf32>
      %c0_10 = arith.constant 0 : index
      %c0_11 = arith.constant 0 : index
      %17 = vector.load %arg9[%c0_10, %c0_11] : memref<1x768xf32, #tpu.memory_space<vmem>>, vector<1x768xf32>
      tpu.vector_store %arg9[%c0_10, %c0_11], %16 {strides = array<i32>} : memref<1x768xf32, #tpu.memory_space<vmem>>, vector<1x768xf32>,
      %c0_12 = arith.constant 0 : index
      %c0_13 = arith.constant 0 : index
      %18 = vector.load %arg10[%c0_12, %c0_13] : memref<1x768xf32, #tpu.memory_space<vmem>>, vector<1x768xf32>
      %19 = arith.mulf %3, %3 : vector<8x768xf32>
      %cst_14 = arith.constant dense<0.000000e+00> : vector<768xf32>
      %20 = vector.multi_reduction <add>, %19, %cst_14 [0] : vector<8x768xf32> to vector<768xf32>
      %21 = vector.shape_cast %20 : vector<768xf32> to vector<1x768xf32>
      %22 = arith.addf %18, %21 : vector<1x768xf32>
      %c0_15 = arith.constant 0 : index
      %c0_16 = arith.constant 0 : index
      %23 = vector.load %arg10[%c0_15, %c0_16] : memref<1x768xf32, #tpu.memory_space<vmem>>, vector<1x768xf32>
      tpu.vector_store %arg10[%c0_15, %c0_16], %22 {strides = array<i32>} : memref<1x768xf32, #tpu.memory_space<vmem>>, vector<1x768xf32>,
      %c0_i32_17 = arith.constant 0 : i32
      %24 = arith.cmpi eq, %arg1, %c0_i32_17 : i32
      %25 = arith.extui %24 : i1 to i32
      %c0_i32_18 = arith.constant 0 : i32
      %26 = arith.cmpi ne, %25, %c0_i32_18 : i32
      scf.if %26 {
        %c0_19 = arith.constant 0 : index
        %c0_20 = arith.constant 0 : index
        %27 = vector.load %arg9[%c0_19, %c0_20] : memref<1x768xf32, #tpu.memory_space<vmem>>, vector<1x768xf32>
        %cst_21 = arith.constant 1.250000e-01 : f32
        %28 = vector.broadcast %cst_21 : f32 to vector<1x768xf32>
        %29 = arith.mulf %27, %28 : vector<1x768xf32>
        %c0_22 = arith.constant 0 : index
        %c0_23 = arith.constant 0 : index
        %30 = vector.load %arg10[%c0_22, %c0_23] : memref<1x768xf32, #tpu.memory_space<vmem>>, vector<1x768xf32>
        %cst_24 = arith.constant 1.250000e-01 : f32
        %31 = vector.broadcast %cst_24 : f32 to vector<1x768xf32>
        %32 = arith.mulf %30, %31 : vector<1x768xf32>
        %33 = arith.mulf %29, %29 : vector<1x768xf32>
        %34 = arith.subf %32, %33 : vector<1x768xf32>
        %c0_25 = arith.constant 0 : index
        %c0_26 = arith.constant 0 : index
        %35 = vector.load %arg4[%c0_25, %c0_26] : memref<1x768xf32, #tpu.memory_space<vmem>>, vector<1x768xf32>
        %cst_27 = arith.constant 9.99999974E-6 : f32
        %36 = vector.broadcast %cst_27 : f32 to vector<1x768xf32>
        %37 = arith.addf %34, %36 : vector<1x768xf32>
        %38 = math.rsqrt %37 : vector<1x768xf32>
        %39 = arith.mulf %35, %38 : vector<1x768xf32>
        %c0_28 = arith.constant 0 : index
        %c0_29 = arith.constant 0 : index
        %40 = vector.load %arg11[%c0_28, %c0_29] : memref<1x768xf32, #tpu.memory_space<vmem>>, vector<1x768xf32>
        tpu.vector_store %arg11[%c0_28, %c0_29], %39 {strides = array<i32>} : memref<1x768xf32, #tpu.memory_space<vmem>>, vector<1x768xf32>,
        %c0_30 = arith.constant 0 : index
        %c0_31 = arith.constant 0 : index
        %41 = vector.load %arg5[%c0_30, %c0_31] : memref<1x768xf32, #tpu.memory_space<vmem>>, vector<1x768xf32>
        %c0_32 = arith.constant 0 : index
        %c0_33 = arith.constant 0 : index
        %42 = vector.load %arg11[%c0_32, %c0_33] : memref<1x768xf32, #tpu.memory_space<vmem>>, vector<1x768xf32>
        %43 = arith.mulf %29, %42 : vector<1x768xf32>
        %44 = arith.subf %41, %43 : vector<1x768xf32>
        %c0_34 = arith.constant 0 : index
        %c0_35 = arith.constant 0 : index
        %45 = vector.load %arg12[%c0_34, %c0_35] : memref<1x768xf32, #tpu.memory_space<vmem>>, vector<1x768xf32>
        tpu.vector_store %arg12[%c0_34, %c0_35], %44 {strides = array<i32>} : memref<1x768xf32, #tpu.memory_space<vmem>>, vector<1x768xf32>,
      } else {
      }
    } else {
    }
    %c1_i32 = arith.constant 1 : i32
    %7 = arith.cmpi eq, %arg0, %c1_i32 : i32
    %8 = arith.extui %7 : i1 to i32
    %c0_i32_4 = arith.constant 0 : i32
    %9 = arith.cmpi ne, %8, %c0_i32_4 : i32
    scf.if %9 {
      %c0_5 = arith.constant 0 : index
      %c0_6 = arith.constant 0 : index
      %10 = vector.load %arg11[%c0_5, %c0_6] : memref<1x768xf32, #tpu.memory_space<vmem>>, vector<1x768xf32>
      %11 = vector.broadcast %10 : vector<1x768xf32> to vector<8x768xf32>
      %12 = arith.mulf %3, %11 : vector<8x768xf32>
      %c0_7 = arith.constant 0 : index
      %c0_8 = arith.constant 0 : index
      %13 = vector.load %arg12[%c0_7, %c0_8] : memref<1x768xf32, #tpu.memory_space<vmem>>, vector<1x768xf32>
      %14 = vector.broadcast %13 : vector<1x768xf32> to vector<8x768xf32>
      %15 = arith.addf %12, %14 : vector<8x768xf32>
      %cst_9 = arith.constant 0.000000e+00 : f32
      %16 = vector.broadcast %cst_9 : f32 to vector<8x768xf32>
      %17 = arith.maximumf %15, %16 : vector<8x768xf32>
      %18 = arith.truncf %17 : vector<8x768xf32> to vector<8x768xbf16>
      %c0_10 = arith.constant 0 : index
      %c0_11 = arith.constant 0 : index
      %19 = vector.load %arg6[%c0_10, %c0_11] : memref<768x256xbf16, #tpu.memory_space<vmem>>, vector<768x256xbf16>
      %cst_12 = arith.constant dense<0.000000e+00> : vector<8x256xf32>
      %20 = tpu.matmul %18, %19, %cst_12 {dimension_numbers = #tpu.dot_dimension_numbers<[1], [0], [0], [1], [0, 0, 1, 1], [], []>} : vector<8x768xbf16>, vector<768x256xbf16>, vector<8x256xf32> -> vector<8x256xf32>
      %c0_13 = arith.constant 0 : index
      %c0_14 = arith.constant 0 : index
      %21 = vector.load %arg7[%c0_13, %c0_14] : memref<1x256xf32, #tpu.memory_space<vmem>>, vector<1x256xf32>
      %22 = vector.broadcast %21 : vector<1x256xf32> to vector<8x256xf32>
      %23 = arith.addf %20, %22 : vector<8x256xf32>
      %24 = vector.extract_strided_slice %23 {offsets = [0, 0], sizes = [8, 128], strides = [1, 1]} : vector<8x256xf32> to vector<8x128xf32>
      %25 = vector.extract_strided_slice %23 {offsets = [0, 128], sizes = [8, 128], strides = [1, 1]} : vector<8x256xf32> to vector<8x128xf32>
      %26 = arith.mulf %25, %25 : vector<8x128xf32>
      %cst_15 = arith.constant dense<0.000000e+00> : vector<8xf32>
      %27 = vector.multi_reduction <add>, %26, %cst_15 [1] : vector<8x128xf32> to vector<8xf32>
      %28 = vector.shape_cast %27 : vector<8xf32> to vector<8x1xf32>
      %cst_16 = arith.constant 1.000000e-24 : f32
      %29 = vector.broadcast %cst_16 : f32 to vector<8x1xf32>
      %30 = arith.maximumf %28, %29 : vector<8x1xf32>
      %31 = math.rsqrt %30 : vector<8x1xf32>
      %32 = vector.broadcast %31 : vector<8x1xf32> to vector<8x128xf32>
      %33 = arith.mulf %25, %32 : vector<8x128xf32>
      %34 = tpu.concatenate %24, %33 in 1 : vector<8x128xf32>, vector<8x128xf32> -> vector<8x256xf32>
      %c0_17 = arith.constant 0 : index
      %c0_18 = arith.constant 0 : index
      %35 = vector.load %arg8[%c0_17, %c0_18] : memref<8x256xf32, #tpu.memory_space<vmem>>, vector<8x256xf32>
      tpu.vector_store %arg8[%c0_17, %c0_18], %34 {strides = array<i32>} : memref<8x256xf32, #tpu.memory_space<vmem>>, vector<8x256xf32>,
    } else {
    }
    return
  }
  func.func @transform_0(%arg0: i32, %arg1: i32) -> (i32, i32) {
    %c0_i32 = arith.constant 0 : i32
    %c0_i32_0 = arith.constant 0 : i32
    return %arg1, %c0_i32 : i32, i32
  }
  func.func @transform_1(%arg0: i32, %arg1: i32) -> (i32, i32) {
    %c0_i32 = arith.constant 0 : i32
    %c0_i32_0 = arith.constant 0 : i32
    %c0_i32_1 = arith.constant 0 : i32
    return %c0_i32, %c0_i32_0 : i32, i32
  }
  func.func @transform_2(%arg0: i32, %arg1: i32) -> (i32, i32) {
    %c0_i32 = arith.constant 0 : i32
    %c0_i32_0 = arith.constant 0 : i32
    %c0_i32_1 = arith.constant 0 : i32
    return %c0_i32, %c0_i32_0 : i32, i32
  }
  func.func @transform_3(%arg0: i32, %arg1: i32) -> (i32, i32) {
    %c0_i32 = arith.constant 0 : i32
    %c0_i32_0 = arith.constant 0 : i32
    %c0_i32_1 = arith.constant 0 : i32
    return %c0_i32, %c0_i32_0 : i32, i32
  }
  func.func @transform_4(%arg0: i32, %arg1: i32) -> (i32, i32) {
    %c0_i32 = arith.constant 0 : i32
    %c0_i32_0 = arith.constant 0 : i32
    %c0_i32_1 = arith.constant 0 : i32
    return %c0_i32, %c0_i32_0 : i32, i32
  }
  func.func @transform_5(%arg0: i32, %arg1: i32) -> (i32, i32) {
    %c0_i32 = arith.constant 0 : i32
    %c0_i32_0 = arith.constant 0 : i32
    %c0_i32_1 = arith.constant 0 : i32
    return %c0_i32, %c0_i32_0 : i32, i32
  }
  func.func @transform_6(%arg0: i32, %arg1: i32) -> (i32, i32) {
    %0 = arith.muli %arg0, %arg1 : i32
    %c0_i32 = arith.constant 0 : i32
    %c0_i32_0 = arith.constant 0 : i32
    return %0, %c0_i32 : i32, i32
  }
}

</mosaic_0001>

<bundles_post_ra>
// kernel: tpu_custom_call.1
= control target key start
LH: loop header
LB: loop body
LE: loop exit
PB: predicated region body
PF: predicated region fallthrough
CT: control target
= control target key end

     0   :  { %11 = vsyncpa [#allocation7], 0  ;;  %s3236_s0 = inlined_call_operand.hbm [shape: f32[8,256], index: 0, kind: input, shape index: {}]   ;;  %s3237_s1 = inlined_call_operand.hbm [shape: bf16[256,768], index: 1, kind: input, shape index: {}]   ;;  %s3238_s2 = inlined_call_operand.hbm [shape: f32[1,768], index: 2, kind: input, shape index: {}]   ;;  %s3239_s3 = inlined_call_operand.hbm [shape: f32[1,768], index: 3, kind: input, shape index: {}]   ;;  %s3240_s4 = inlined_call_operand.hbm [shape: bf16[768,256], index: 4, kind: input, shape index: {}]   ;;  %s3241_s5 = inlined_call_operand.vmem [shape: f32[1,256], index: 5, kind: input, shape index: {}]   ;;  %s3242_s6 = inlined_call_operand.hbm [shape: f32[8,256], index: 6, kind: output, shape index: {}]  }
   0x1   :  { %12 = vsyncpa [#allocation10], 0 }
   0x2   :  { %13 = vsyncpa [#allocation13], 0 }
   0x3   :  { %14 = vsyncpa [#allocation8], 0 }
   0x4   :  { %16 = vsyncpa [#allocation8 + $0x1], 0  ;;  %s3010_s21 = smov 0   ;;  %s3012_s22 = smov 0  }
   0x5   :  { %s3014_s23 = smov 0  }
   0x6 LB: > { %s2963_s24 = smov [#allocation9]   ;;  %s2172_s26 = sadd.s32 4294967295, %s2961_s23   ;;  %s2961_s23 = sphi %s3014_s23, %s22_s23   ;;  %s2957_s22 = sphi %s3012_s22, %s3256_s22   ;;  %s2953_s21 = sphi %s3010_s21, %s3255_s21  }
   0x7   : > { %s224_s25 = sshll.u32 %s2963_s24, 4  ;;  %s2173_s27 = sadd.s32 4294967294, %s2961_s23   ;;  %s225_s25 = int_to_ptr.vmem [resolvable:$true] %s224_s25 }
   0x8   : > { %p2174_p0 = scmp.ge.s32.totalorder %s2961_s23, 1  ;;  %p198_p1 = scmp.lt.s32.totalorder %s2961_s23, 3 }
   0x9   : > { %p3031_p2 = scmp.eq.s32.totalorder %s2172_s26, 0  ;;  %s2964_s30 = smov [#allocation12]  }
   0xa   : > { %p3035_p3 = pnand %p2174_p0, %p198_p1  ;;  %s249_s7 = sshll.u32 %s2964_s30, 4  ;;  %s250_s7 = int_to_ptr.vmem [resolvable:$true] %s249_s7 }
   0xb   : > { %s3246_s28 = scalar_select %p3031_p2, 1, 0 }
   0xc   : > { %s3247_s29 = scalar_select %p3035_p3, 1, 0 }
   0xd   : > { %p2408_p4 = pneg %p3035_p3  ;;  %s2780_s10 = scalar_lea.vmem %s225_s25, 12288 }
   0xe   : > { %p2781_p7 = scmp.ne.s32.totalorder %s225_s25, %s2780_s10  ;;  %p2788_p10 = scmp.lt.s32.totalorder %s225_s25, %s225_s25 }
   0xf   : > { %p3043_p5 = pnand %p3031_p2, %p2408_p4  ;;  %p2789_p11 = scmp.lt.s32.totalorder %s2780_s10, %s2780_s10 }
  0x11   : > { %p3049_p6 = pneg %p3043_p5  ;;  %p2790_p12 = por %p2789_p11, %p2788_p10 }
  0x13   : > { %p2783_p8 = pnand %p2781_p7, %p3049_p6 }
  0x15   : > { %p2784_p9 = pneg %p2783_p8 }
  0x17   : > { %p2791_p13 = pnand %p2790_p12, %p2784_p9 }
  0x19   : > { %2794 = shalt.err (!%p2791_p13)
}
  0x1a   : > { %s2965_s11 = smov 384   ;;  %s2966_s12 = smov 24  }
  0x1b   : > { %2414 = dma.hbm_to_vmem [thread:$0]  (!%p3043_p5), %s3237_s1, 12288, %s225_s25, [#allocation10], %s2965_s11, %s2965_s11, %s2966_s12  }
  0x1c   : > { %s2806_s15 = scalar_lea.vmem %s250_s7, 96  ;;  %p2814_p7 = scmp.lt.s32.totalorder %s250_s7, %s250_s7 }
  0x1d   : > { %p2807_p0 = scmp.ne.s32.totalorder %s250_s7, %s2806_s15  ;;  %p2815_p8 = scmp.lt.s32.totalorder %s2806_s15, %s2806_s15 }
  0x1f   : > { %p2809_p1 = pnand %p2807_p0, %p3049_p6  ;;  %p2816_p2 = por %p2815_p8, %p2814_p7 }
  0x21   : > { %p2810_p4 = pneg %p2809_p1 }
  0x23   : > { %p2817_p10 = pnand %p2816_p2, %p2810_p4 }
  0x25   : > { %2820 = shalt.err (!%p2817_p10)
}
  0x26   : > { %2420 = dma.hbm_to_vmem [thread:$0]  (!%p3043_p5), %s3239_s3, 96, %s250_s7, [#allocation13]  }
  0x27   : > { %s34_s18 = sadd.s32 1, %s2957_s22  ;;  %s2967_s19 = smov [#allocation6]  }
  0x28   : > { %p36_p9 = scmp.ge.s32.totalorder %s34_s18, 2  ;;  %s214_s20 = sshll.u32 %s2967_s19, 4  ;;  %s215_s20 = int_to_ptr.vmem [resolvable:$true] %s214_s20 }
  0x29   : > { %s2832_s24 = scalar_lea.vmem %s215_s20, 256  ;;  %p2840_p13 = scmp.lt.s32.totalorder %s215_s20, %s215_s20 }
  0x2a   : > { %s3258_s18 = smov (%p36_p9, %s34_s18), 0  ;;  %p2833_p11 = scmp.ne.s32.totalorder %s215_s20, %s2832_s24 }
  0x2b   : > { %p2841_p0 = scmp.lt.s32.totalorder %s2832_s24, %s2832_s24 }
  0x2c   : > { %p2835_p2 = pnand %p2833_p11, %p3049_p6 }
  0x2d   : > { %p2842_p1 = por %p2841_p0, %p2840_p13 }
  0x2e   : > { %p2836_p12 = pneg %p2835_p2 }
  0x30   : > { %p2843_p4 = pnand %p2842_p1, %p2836_p12 }
  0x32   : > { %2846 = shalt.err (!%p2843_p4)
}
  0x33   : > { %2411 = dma.hbm_to_vmem [thread:$0]  (!%p3043_p5), %s3236_s0, 256, %s215_s20, [#allocation7]  }
  0x34   : > { %s2968_s7 = smov [#allocation11]   ;;  %s2969_s11 = smov [#allocation14]  }
  0x35   : > { %s238_s10 = sshll.u32 %s2968_s7, 4  ;;  %s259_s12 = sshll.u32 %s2969_s11, 4  ;;  %s239_s10 = int_to_ptr.vmem [resolvable:$true] %s238_s10  ;;  %s260_s12 = int_to_ptr.vmem [resolvable:$true] %s259_s12 }
  0x36   : > { %s2858_s13 = scalar_lea.vmem %s239_s10, 96  ;;  %p2866_p9 = scmp.lt.s32.totalorder %s239_s10, %s239_s10 }
  0x37   : > { %p2859_p7 = scmp.ne.s32.totalorder %s239_s10, %s2858_s13  ;;  %p2867_p11 = scmp.lt.s32.totalorder %s2858_s13, %s2858_s13 }
  0x39   : > { %p2861_p8 = pnand %p2859_p7, %p3049_p6  ;;  %p2868_p2 = por %p2867_p11, %p2866_p9 }
  0x3b   : > { %p2862_p10 = pneg %p2861_p8 }
  0x3d   : > { %p2869_p12 = pnand %p2868_p2, %p2862_p10 }
  0x3f   : > { %2872 = shalt.err (!%p2869_p12)
}
  0x40   : > { %2417 = dma.hbm_to_vmem [thread:$0]  (!%p3043_p5), %s3238_s2, 96, %s239_s10, [#allocation10]  }
  0x41   : > { %s2884_s16 = scalar_lea.vmem %s260_s12, 12288  ;;  %p2892_p4 = scmp.lt.s32.totalorder %s260_s12, %s260_s12 }
  0x42   : > { %p2885_p13 = scmp.ne.s32.totalorder %s260_s12, %s2884_s16  ;;  %p2893_p7 = scmp.lt.s32.totalorder %s2884_s16, %s2884_s16 }
  0x44   : > { %p2887_p0 = pnand %p2885_p13, %p3049_p6  ;;  %p2894_p8 = por %p2893_p7, %p2892_p4 }
  0x46   : > { %p2888_p1 = pneg %p2887_p0 }
  0x48   : > { %p2895_p3 = pnand %p2894_p8, %p2888_p1 }
  0x4a   : > { %2898 = shalt.err (!%p2895_p3)
}
  0x4b   : > { %s2970_s17 = smov 128   ;;  %s2971_s19 = smov 8  }
  0x4c   : > { %2423 = dma.hbm_to_vmem [thread:$0]  (!%p3043_p5), %s3240_s4, 12288, %s260_s12, [#allocation13], %s2970_s17, %s2970_s17, %s2971_s19  }
  0x4d   : > { %p3250_p10 = scmp.ne.s32.totalorder %s3247_s29, 0 }
  0x4e   : > { %p3251_p9 = scmp.ne.s32.totalorder (!%p3250_p10), %s3246_s28, 0 }
  0x4f   : > { %278 = sbr.rel (%p3250_p10) target bundleno = 1004 (0x3ec), region = 44 }
  0x54   : > { %2936 = dma.done.wait (%p3251_p9), [#allocation7], 256  }
  0x55   : > { %2938 = vsyncadd (%p3251_p9), [#allocation7], 4294967040 }
  0x56   : > { %2940 = dma.done.wait (%p3251_p9), [#allocation10], 12384  }
  0x57   : > { %2942 = vsyncadd (%p3251_p9), [#allocation10], 4294954912 }
  0x58   : > { %2944 = dma.done.wait (%p3251_p9), [#allocation13], 12384  }
  0x59   : > { %2946 = vsyncadd (%p3251_p9), [#allocation13], 4294954912  ;;  %v2477_v0 = vld [vmem:[#allocation9 + $0x154] ss:$24 sps:$4 sm:$0xff]   ;;  %v2479_v1 = vld [vmem:[#allocation9 + $0x150] ss:$24 sps:$4 sm:$0xff]  }
  0x5a   : > { %900 = vmatprep.subr.bf16.mxu0 %v2477_v0  ;;  %v2480_v2 = vld [vmem:[#allocation9 + $0x124] ss:$24 sps:$4 sm:$0xff]   ;;  %v2482_v3 = vld [vmem:[#allocation9 + $0x120] ss:$24 sps:$4 sm:$0xff]   ;;  %v2483_v4 = vld [vmem:[#allocation9 + $0xf4] ss:$24 sps:$4 sm:$0xff]  }
  0x5b   : > { %901 = vmatpush1.bf16.msra.mxu0 %v2479_v1  ;;  %v2485_v5 = vld [vmem:[#allocation9 + $0xf0] ss:$24 sps:$4 sm:$0xff]   ;;  %v2486_v6 = vld [vmem:[#allocation9 + $0xc4] ss:$24 sps:$4 sm:$0xff]   ;;  %v2488_v7 = vld [vmem:[#allocation9 + $0xc0] ss:$24 sps:$4 sm:$0xff]  }
  0x5c   : > { %902 = vmatprep.subr.bf16.mxu0 %v2480_v2  ;;  %v2489_v8 = vld [vmem:[#allocation9 + $0x94] ss:$24 sps:$4 sm:$0xff]   ;;  %v2491_v9 = vld [vmem:[#allocation9 + $0x90] ss:$24 sps:$4 sm:$0xff]   ;;  %v2492_v10 = vld [vmem:[#allocation9 + $0x64] ss:$24 sps:$4 sm:$0xff]  }
  0x5d   : > { %v2494_v11 = vld [vmem:[#allocation9 + $0x60] ss:$24 sps:$4 sm:$0xff]   ;;  %v2495_v12 = vld [vmem:[#allocation9 + $0x34] ss:$24 sps:$4 sm:$0xff]   ;;  %v2497_v15 = vld [vmem:[#allocation9 + $0x30] ss:$24 sps:$4 sm:$0xff]  }
  0x5e   : > { %v2522_v13 = vld [vmem:[#allocation9 + $0x15c] ss:$24 sps:$4 sm:$0xff]   ;;  %v2524_v14 = vld [vmem:[#allocation9 + $0x158] ss:$24 sps:$4 sm:$0xff]   ;;  %v2528_v16 = vld [vmem:[#allocation9 + $0x12c] ss:$24 sps:$4 sm:$0xff]  }
  0x5f   : > { %903 = vmatpush1.bf16.msra.mxu0 %v2482_v3  ;;  %941 = vmatprep.subr.bf16.mxu1 %v2522_v13  ;;  %v321_v17 = vld [vmem:[#allocation6 + $0x8] sm:$0xff]  ;;  %v2530_v20 = vld [vmem:[#allocation9 + $0x128] ss:$24 sps:$4 sm:$0xff]   ;;  %v2501_v24 = vld [vmem:[#allocation9 + $0x2d4] ss:$24 sps:$4 sm:$0xff]   ;;  %p2282_p3 = scmp.ne.s32.totalorder %s2953_s21, 0 }
  0x60   : > { %904 = vmatprep.subr.bf16.mxu0 %v2483_v4  ;;  %942 = vmatpush1.bf16.msra.mxu1 %v2524_v14  ;;  %v2498_v18 = vld [vmem:[#allocation9 + $0x4] ss:$24 sps:$4 sm:$0xff]   ;;  %v3105_v19 = vpack.c.bf16 %v321_v17, %v321_v17  ;;  %v2500_v21 = vld [vmem:[#allocation9] ss:$24 sps:$4 sm:$0xff]   ;;  %v2503_v26 = vld [vmem:[#allocation9 + $0x2d0] ss:$24 sps:$4 sm:$0xff]  }
  0x61   : > { %943 = vmatprep.subr.bf16.mxu1 %v2528_v16  ;;  %v2534_v22 = vld [vmem:[#allocation9 + $0xfc] ss:$24 sps:$4 sm:$0xff]   ;;  %v2536_v23 = vld [vmem:[#allocation9 + $0xf8] ss:$24 sps:$4 sm:$0xff]   ;;  %v2540_v25 = vld [vmem:[#allocation9 + $0xcc] ss:$24 sps:$4 sm:$0xff]  }
  0x62   : > { %932 = vmatprep.mubr.bf16.mxu0 %v3105_v19  ;;  %973 = vmatprep.mubr.bf16.mxu1 %v3105_v19  ;;  %v2542_v27 = vld [vmem:[#allocation9 + $0xc8] ss:$24 sps:$4 sm:$0xff]   ;;  %v2504_v28 = vld [vmem:[#allocation9 + $0x2a4] ss:$24 sps:$4 sm:$0xff]   ;;  %v2548_v31 = vld [vmem:[#allocation9 + $0x98] ss:$24 sps:$4 sm:$0xff]  }
  0x63   : > { %905 = vmatpush1.bf16.msra.mxu0 %v2485_v5  ;;  %v2546_v29 = vld [vmem:[#allocation9 + $0x9c] ss:$24 sps:$4 sm:$0xff]   ;;  %v2506_v30 = vld [vmem:[#allocation9 + $0x2a0] ss:$24 sps:$4 sm:$0xff]   ;;  %v2552_v33 = vld [vmem:[#allocation9 + $0x6c] ss:$24 sps:$4 sm:$0xff]  }
  0x64   : > { %906 = vmatprep.subr.bf16.mxu0 %v2486_v6  ;;  %944 = vmatpush1.bf16.msra.mxu1 %v2530_v20  ;;  %v2507_v32 = vld [vmem:[#allocation9 + $0x274] ss:$24 sps:$4 sm:$0xff]   ;;  %v2509_v34 = vld [vmem:[#allocation9 + $0x270] ss:$24 sps:$4 sm:$0xff]   ;;  %v2510_v36 = vld [vmem:[#allocation9 + $0x244] ss:$24 sps:$4 sm:$0xff]  }
  0x65   : > { %945 = vmatprep.subr.bf16.mxu1 %v2534_v22  ;;  %v2554_v35 = vld [vmem:[#allocation9 + $0x68] ss:$24 sps:$4 sm:$0xff]   ;;  %v2558_v37 = vld [vmem:[#allocation9 + $0x3c] ss:$24 sps:$4 sm:$0xff]   ;;  %v2560_v39 = vld [vmem:[#allocation9 + $0x38] ss:$24 sps:$4 sm:$0xff]  }
  0x66   : > { %v2512_v38 = vld [vmem:[#allocation9 + $0x240] ss:$24 sps:$4 sm:$0xff]   ;;  %v2513_v40 = vld [vmem:[#allocation9 + $0x214] ss:$24 sps:$4 sm:$0xff]   ;;  %v2515_v42 = vld [vmem:[#allocation9 + $0x210] ss:$24 sps:$4 sm:$0xff]  }
  0x67   : > { %907 = vmatpush1.bf16.msra.mxu0 %v2488_v7  ;;  %v2564_v41 = vld [vmem:[#allocation9 + $0xc] ss:$24 sps:$4 sm:$0xff]   ;;  %v2566_v43 = vld [vmem:[#allocation9 + $0x8] ss:$24 sps:$4 sm:$0xff]   ;;  %v2570_v45 = vld [vmem:[#allocation9 + $0x2dc] ss:$24 sps:$4 sm:$0xff]  }
  0x68   : > { %908 = vmatprep.subr.bf16.mxu0 %v2489_v8  ;;  %946 = vmatpush1.bf16.msra.mxu1 %v2536_v23  ;;  %v2516_v44 = vld [vmem:[#allocation9 + $0x1e4] ss:$24 sps:$4 sm:$0xff]   ;;  %v2518_v46 = vld [vmem:[#allocation9 + $0x1e0] ss:$24 sps:$4 sm:$0xff]   ;;  %v2519_v48 = vld [vmem:[#allocation9 + $0x1b4] ss:$24 sps:$4 sm:$0xff]  }
  0x69   : > { %947 = vmatprep.subr.bf16.mxu1 %v2540_v25  ;;  %v2572_v47 = vld [vmem:[#allocation9 + $0x2d8] ss:$24 sps:$4 sm:$0xff]   ;;  %v2576_v49 = vld [vmem:[#allocation9 + $0x2ac] ss:$24 sps:$4 sm:$0xff]   ;;  %v2578_v51 = vld [vmem:[#allocation9 + $0x2a8] ss:$24 sps:$4 sm:$0xff]  }
  0x6a   : > { %v2521_v50 = vld [vmem:[#allocation9 + $0x1b0] ss:$24 sps:$4 sm:$0xff]   ;;  %v2525_v52 = vld [vmem:[#allocation9 + $0x184] ss:$24 sps:$4 sm:$0xff]   ;;  %v2527_v54 = vld [vmem:[#allocation9 + $0x180] ss:$24 sps:$4 sm:$0xff]  }
  0x6b   : > { %909 = vmatpush1.bf16.msra.mxu0 %v2491_v9  ;;  %v2582_v53 = vld [vmem:[#allocation9 + $0x27c] ss:$24 sps:$4 sm:$0xff]   ;;  %v2584_v56 = vld [vmem:[#allocation9 + $0x278] ss:$24 sps:$4 sm:$0xff]   ;;  %v2588_v58 = vld [vmem:[#allocation9 + $0x24c] ss:$24 sps:$4 sm:$0xff]  }
  0x6c   : > { %910 = vmatprep.subr.bf16.mxu0 %v2492_v10  ;;  %948 = vmatpush1.bf16.msra.mxu1 %v2542_v27  ;;  %v320_v55 = vld [vmem:[#allocation6] sm:$0xff]  ;;  %v2533_v57 = vld [vmem:[#allocation9 + $0x164] ss:$24 sps:$4 sm:$0xff]   ;;  %v2531_v60 = vld [vmem:[#allocation9 + $0x160] ss:$24 sps:$4 sm:$0xff]  }
  0x6d   : > { %949 = vmatprep.subr.bf16.mxu1 %v2546_v29  ;;  %v3109_v59 = vpack.c.bf16 %v320_v55, %v320_v55  ;;  %v2590_v61 = vld [vmem:[#allocation9 + $0x248] ss:$24 sps:$4 sm:$0xff]   ;;  %v2539_v62 = vld [vmem:[#allocation9 + $0x134] ss:$24 sps:$4 sm:$0xff]   ;;  %v2596_v1 = vld [vmem:[#allocation9 + $0x218] ss:$24 sps:$4 sm:$0xff]  }
  0x6e   : > { %v2594_v63 = vld [vmem:[#allocation9 + $0x21c] ss:$24 sps:$4 sm:$0xff]   ;;  %v2537_v0 = vld [vmem:[#allocation9 + $0x130] ss:$24 sps:$4 sm:$0xff]   ;;  %v2600_v3 = vld [vmem:[#allocation9 + $0x1ec] ss:$24 sps:$4 sm:$0xff]  }
  0x6f   : > { %911 = vmatpush1.bf16.msra.mxu0 %v2494_v11  ;;  %v2545_v2 = vld [vmem:[#allocation9 + $0x104] ss:$24 sps:$4 sm:$0xff]   ;;  %v2543_v4 = vld [vmem:[#allocation9 + $0x100] ss:$24 sps:$4 sm:$0xff]   ;;  %v2551_v6 = vld [vmem:[#allocation9 + $0xd4] ss:$24 sps:$4 sm:$0xff]  }
  0x70   : > { %912 = vmatprep.subr.bf16.mxu0 %v2495_v12  ;;  %950 = vmatpush1.bf16.msra.mxu1 %v2548_v31  ;;  %v2602_v5 = vld [vmem:[#allocation9 + $0x1e8] ss:$24 sps:$4 sm:$0xff]   ;;  %v2606_v7 = vld [vmem:[#allocation9 + $0x1bc] ss:$24 sps:$4 sm:$0xff]   ;;  %v2608_v9 = vld [vmem:[#allocation9 + $0x1b8] ss:$24 sps:$4 sm:$0xff]  }
  0x71   : > { %951 = vmatprep.subr.bf16.mxu1 %v2552_v33  ;;  %v2549_v8 = vld [vmem:[#allocation9 + $0xd0] ss:$24 sps:$4 sm:$0xff]   ;;  %v2557_v10 = vld [vmem:[#allocation9 + $0xa4] ss:$24 sps:$4 sm:$0xff]   ;;  %v2555_v12 = vld [vmem:[#allocation9 + $0xa0] ss:$24 sps:$4 sm:$0xff]  }
  0x72   : > { %v2612_v11 = vld [vmem:[#allocation9 + $0x18c] ss:$24 sps:$4 sm:$0xff]   ;;  %v2614_v13 = vld [vmem:[#allocation9 + $0x188] ss:$24 sps:$4 sm:$0xff]  }
  0x73   : > { %913 = vmatpush1.bf16.msra.mxu0 %v2497_v15  ;;  %v2563_v14 = vld [vmem:[#allocation9 + $0x74] ss:$24 sps:$4 sm:$0xff]   ;;  %v2561_v15 = vld [vmem:[#allocation9 + $0x70] ss:$24 sps:$4 sm:$0xff]   ;;  %v2569_v16 = vld [vmem:[#allocation9 + $0x44] ss:$24 sps:$4 sm:$0xff]  }
  0x74   : > { %914 = vmatprep.subr.bf16.mxu0 %v2498_v18  ;;  %952 = vmatpush1.bf16.msra.mxu1 %v2554_v35  ;;  %v2567_v17 = vld [vmem:[#allocation9 + $0x40] ss:$24 sps:$4 sm:$0xff]   ;;  %v2575_v18 = vld [vmem:[#allocation9 + $0x14] ss:$24 sps:$4 sm:$0xff]   ;;  %v2581_v20 = vld [vmem:[#allocation9 + $0x2e4] ss:$24 sps:$4 sm:$0xff]  }
  0x75   : > { %953 = vmatprep.subr.bf16.mxu1 %v2558_v37  ;;  %v2587_v22 = vld [vmem:[#allocation9 + $0x2b4] ss:$24 sps:$4 sm:$0xff]   ;;  %v2585_v23 = vld [vmem:[#allocation9 + $0x2b0] ss:$24 sps:$4 sm:$0xff]   ;;  %v2591_v25 = vld [vmem:[#allocation9 + $0x280] ss:$24 sps:$4 sm:$0xff]  }
  0x76   : > { %v2597_v27 = vld [vmem:[#allocation9 + $0x250] ss:$24 sps:$4 sm:$0xff]   ;;  %v2603_v29 = vld [vmem:[#allocation9 + $0x220] ss:$24 sps:$4 sm:$0xff]  }
  0x77   : > { %915 = vmatpush1.bf16.msra.mxu0 %v2500_v21  ;;  %v2579_v21 = vld [vmem:[#allocation9 + $0x2e0] ss:$24 sps:$4 sm:$0xff]   ;;  %v2609_v31 = vld [vmem:[#allocation9 + $0x1f0] ss:$24 sps:$4 sm:$0xff]  }
  0x78   : > { %916 = vmatprep.subr.bf16.mxu0 %v2501_v24  ;;  %954 = vmatpush1.bf16.msra.mxu1 %v2560_v39  ;;  %v2593_v24 = vld [vmem:[#allocation9 + $0x284] ss:$24 sps:$4 sm:$0xff]   ;;  %v2615_v33 = vld [vmem:[#allocation9 + $0x1c0] ss:$24 sps:$4 sm:$0xff]   ;;  %v2618_v35 = vld [vmem:[#allocation9 + $0x190] ss:$24 sps:$4 sm:$0xff]  }
  0x79   : > { %955 = vmatprep.subr.bf16.mxu1 %v2564_v41 }
  0x7b   : > { %917 = vmatpush2.bf16.msra.mxu0 %v2503_v26  ;;  %v2599_v26 = vld [vmem:[#allocation9 + $0x254] ss:$24 sps:$4 sm:$0xff]  }
  0x7c   : > { %918 = vmatprep.subr.bf16.mxu0 %v2504_v28  ;;  %956 = vmatpush1.bf16.msra.mxu1 %v2566_v43  ;;  %v2605_v28 = vld [vmem:[#allocation9 + $0x224] ss:$24 sps:$4 sm:$0xff]  }
  0x7d   : > { %957 = vmatprep.subr.bf16.mxu1 %v2570_v45 }
  0x7f   : > { %919 = vmatpush2.bf16.msra.mxu0 %v2506_v30  ;;  %v2611_v30 = vld [vmem:[#allocation9 + $0x1f4] ss:$24 sps:$4 sm:$0xff]  }
  0x80   : > { %920 = vmatprep.subr.bf16.mxu0 %v2507_v32  ;;  %958 = vmatpush2.bf16.msra.mxu1 %v2572_v47  ;;  %v2617_v32 = vld [vmem:[#allocation9 + $0x1c4] ss:$24 sps:$4 sm:$0xff]  }
  0x81   : > { %959 = vmatprep.subr.bf16.mxu1 %v2576_v49 }
  0x83   : > { %921 = vmatpush2.bf16.msra.mxu0 %v2509_v34  ;;  %v2620_v34 = vld [vmem:[#allocation9 + $0x194] ss:$24 sps:$4 sm:$0xff]  }
  0x84   : > { %922 = vmatprep.subr.bf16.mxu0 %v2510_v36  ;;  %960 = vmatpush2.bf16.msra.mxu1 %v2578_v51 }
  0x85   : > { %961 = vmatprep.subr.bf16.mxu1 %v2582_v53 }
  0x87   : > { %923 = vmatpush2.bf16.msra.mxu0 %v2512_v38 }
  0x88   : > { %924 = vmatprep.subr.bf16.mxu0 %v2513_v40  ;;  %962 = vmatpush2.bf16.msra.mxu1 %v2584_v56 }
  0x89   : > { %963 = vmatprep.subr.bf16.mxu1 %v2588_v58 }
  0x8b   : > { %925 = vmatpush2.bf16.msra.mxu0 %v2515_v42 }
  0x8c   : > { %926 = vmatprep.subr.bf16.mxu0 %v2516_v44  ;;  %964 = vmatpush2.bf16.msra.mxu1 %v2590_v61 }
  0x8d   : > { %965 = vmatprep.subr.bf16.mxu1 %v2594_v63 }
  0x8f   : > { %927 = vmatpush2.bf16.msra.mxu0 %v2518_v46 }
  0x90   : > { %928 = vmatprep.subr.bf16.mxu0 %v2519_v48  ;;  %966 = vmatpush2.bf16.msra.mxu1 %v2596_v1 }
  0x91   : > { %967 = vmatprep.subr.bf16.mxu1 %v2600_v3 }
  0x93   : > { %929 = vmatpush2.bf16.msra.mxu0 %v2521_v50 }
  0x94   : > { %930 = vmatprep.subr.bf16.mxu0 %v2525_v52  ;;  %968 = vmatpush2.bf16.msra.mxu1 %v2602_v5 }
  0x95   : > { %969 = vmatprep.subr.bf16.mxu1 %v2606_v7 }
  0x97   : > { %931 = vmatpush2.bf16.msra.mxu0 %v2527_v54 }
  0x98   : > { %982 = vmatprep.subr.bf16.mxu0 %v2533_v57  ;;  %970 = vmatpush2.bf16.msra.mxu1 %v2608_v9 }
  0x99   : > { %971 = vmatprep.subr.bf16.mxu1 %v2612_v11 }
  0x9a   : > { %933 = vmatmul.mubr.bf16.vlgmr.msra.gmra.mxu0 %v3109_v59 }
  0x9b   : > { %983 = vmatpush1.bf16.msra.mxu0 %v2531_v60  ;;  %1014 = vmatprep.mubr.bf16.mxu0 %v3105_v19  ;;  %v2573_v19 = vld [vmem:[#allocation9 + $0x10] ss:$24 sps:$4 sm:$0xff]  }
  0x9c   : > { %984 = vmatprep.subr.bf16.mxu0 %v2539_v62  ;;  %972 = vmatpush2.bf16.msra.mxu1 %v2614_v13 }
  0x9f   : > { %985 = vmatpush1.bf16.msra.mxu0 %v2537_v0  ;;  %974 = vmatmul.mubr.bf16.vlgmr.msra.gmra.mxu1 %v3109_v59 }
  0xa0   : > { %986 = vmatprep.subr.bf16.mxu0 %v2545_v2 }
  0xa3   : > { %987 = vmatpush1.bf16.msra.mxu0 %v2543_v4 }
  0xa4   : > { %988 = vmatprep.subr.bf16.mxu0 %v2551_v6 }
  0xa7   : > { %989 = vmatpush1.bf16.msra.mxu0 %v2549_v8 }
  0xa8   : > { %990 = vmatprep.subr.bf16.mxu0 %v2557_v10 }
  0xab   : > { %991 = vmatpush1.bf16.msra.mxu0 %v2555_v12 }
  0xac   : > { %992 = vmatprep.subr.bf16.mxu0 %v2563_v14 }
  0xaf   : > { %993 = vmatpush1.bf16.msra.mxu0 %v2561_v15 }
  0xb0   : > { %994 = vmatprep.subr.bf16.mxu0 %v2569_v16 }
  0xb3   : > { %995 = vmatpush1.bf16.msra.mxu0 %v2567_v17 }
  0xb4   : > { %996 = vmatprep.subr.bf16.mxu0 %v2575_v18 }
  0xb7   : > { %997 = vmatpush1.bf16.msra.mxu0 %v2573_v19 }
  0xb8   : > { %998 = vmatprep.subr.bf16.mxu0 %v2581_v20 }
  0xbb   : > { %999 = vmatpush2.bf16.msra.mxu0 %v2579_v21 }
  0xbc   : > { %1000 = vmatprep.subr.bf16.mxu0 %v2587_v22 }
  0xbf   : > { %1001 = vmatpush2.bf16.msra.mxu0 %v2585_v23 }
  0xc0   : > { %1002 = vmatprep.subr.bf16.mxu0 %v2593_v24 }
  0xc3   : > { %1003 = vmatpush2.bf16.msra.mxu0 %v2591_v25 }
  0xc4   : > { %1004 = vmatprep.subr.bf16.mxu0 %v2599_v26 }
  0xc7   : > { %1005 = vmatpush2.bf16.msra.mxu0 %v2597_v27 }
  0xc8   : > { %1006 = vmatprep.subr.bf16.mxu0 %v2605_v28 }
  0xcb   : > { %1007 = vmatpush2.bf16.msra.mxu0 %v2603_v29 }
  0xcc   : > { %1008 = vmatprep.subr.bf16.mxu0 %v2611_v30 }
  0xcf   : > { %1009 = vmatpush2.bf16.msra.mxu0 %v2609_v31 }
  0xd0   : > { %1010 = vmatprep.subr.bf16.mxu0 %v2617_v32 }
  0xd3   : > { %1011 = vmatpush2.bf16.msra.mxu0 %v2615_v33 }
  0xd4   : > { %1012 = vmatprep.subr.bf16.mxu0 %v2620_v34 }
  0xd7   : > { %1013 = vmatpush2.bf16.msra.mxu0 %v2618_v35 }
  0xda   : > { %1015 = vmatmul.mubr.bf16.vlgmr.msra.gmra.mxu0 %v3109_v59 }
 0x15a   : > { %v3115_v36 = vpop.f32.mrf.mxu0 }
 0x15c   : > { %v3117_v37 = vpop.f32.mrf.mxu0 }
 0x15e   : > { %v938_v38 = vpop.f32.mrf.mxu0 }
 0x15f   : > { %v3119_v40 = vpop.f32.mrf.mxu1 }
 0x160   : > { %v939_v39 = vpop.f32.mrf.mxu0 }
 0x161   : > { %v3121_v41 = vpop.f32.mrf.mxu1 }
 0x163   : > { %v979_v42 = vpop.f32.mrf.mxu1 }
 0x165   : > { %v980_v43 = vpop.f32.mrf.mxu1 }
 0x19a   : > { %v3123_v44 = vpop.f32.mrf.mxu0 }
 0x19c   : > { %v3125_v45 = vpop.f32.mrf.mxu0  ;;  %1026 = sbr.rel (%p2282_p3) target bundleno = 499 (0x1f3), region = 68 }
 0x19e   : > { %v1020_v46 = vpop.f32.mrf.mxu0 }
 0x1a0   : > { %v1021_v47 = vpop.f32.mrf.mxu0 }
 0x1a1   : > { %v1031_v48 = vlaneseq  ;;  %v1038_v49 = vrot.slane %v3115_v36, 4  ;;  %v2972_v50 = vmov 1966171168   ;;  %v1044_v52 = vrot.slane %v3117_v37, 4 }
 0x1a2   : > { %v1084_v51 = vunpack.c.l.s4 %v2972_v50  ;;  %v1050_v53 = vrot.slane %v3119_v40, 4  ;;  %v1056_v54 = vrot.slane %v3121_v41, 4  ;;  %v1062_v58 = vrot.slane %v3123_v44, 4 }
 0x1a3   : > { %vm3132_vm0 = vcmp.lt.s32.totalorder %v1031_v48, 768  ;;  %v1087_v56 = vshrl.u32 %v1031_v48, 7  ;;  %v1039_v57 = vadd.f32 %v1038_v49, %v3115_v36  ;;  %v2973_v59 = vmov 0.0  }
 0x1a4   : > { %1035 = vst.msk [vmem:[#allocation2] sm:$0x3f] %vm3132_vm0, %v2973_v59  ;;  %v1085_v60 = vunpack.c.0.s8 %v1084_v51  ;;  %1036 = vst.msk [vmem:[#allocation3] sm:$0x3f] %vm3132_vm0, %v2973_v59  ;;  %v1045_v61 = vadd.f32 %v1044_v52, %v3117_v37  ;;  %v1051_v62 = vadd.f32 %v1050_v53, %v3119_v40  ;;  %v1057_v63 = vadd.f32 %v1056_v54, %v3121_v41 }
 0x1a5   : > { %v1040_v0 = vrot.slane %v1039_v57, 2  ;;  %v1063_v1 = vadd.f32 %v1062_v58, %v3123_v44  ;;  %v1068_v2 = vrot.slane %v3125_v45, 4  ;;  %v1128_v3 = vmul.f32 %v3115_v36, %v3115_v36 }
 0x1a6   : > { %v3149_v4 = vsub.s32 %v1085_v60, %v1087_v56  ;;  %v1046_v5 = vrot.slane %v1045_v61, 2  ;;  %v1052_v6 = vrot.slane %v1051_v62, 2  ;;  %v1058_v7 = vrot.slane %v1057_v63, 2 }
 0x1a7   : > { %v1041_v8 = vadd.f32 %v1040_v0, %v1039_v57  ;;  %v1064_v9 = vrot.slane %v1063_v1, 2  ;;  %v1069_v10 = vadd.f32 %v1068_v2, %v3125_v45  ;;  %v1129_v11 = vmul.f32 %v3117_v37, %v3117_v37 }
 0x1a8   : > { %v1047_v12 = vadd.f32 %v1046_v5, %v1045_v61  ;;  %v1053_v13 = vadd.f32 %v1052_v6, %v1051_v62  ;;  %v1059_v14 = vadd.f32 %v1058_v7, %v1057_v63  ;;  %v1130_v15 = vmul.f32 %v3119_v40, %v3119_v40 }
 0x1a9   : > { %v1042_v16 = vrot.slane %v1041_v8, 1  ;;  %v1065_v17 = vadd.f32 %v1064_v9, %v1063_v1  ;;  %v1070_v18 = vrot.slane %v1069_v10, 2  ;;  %v1131_v19 = vmul.f32 %v3121_v41, %v3121_v41 }
 0x1aa   : > { %v1048_v20 = vrot.slane %v1047_v12, 1  ;;  %v1054_v21 = vrot.slane %v1053_v13, 1  ;;  %v1060_v22 = vrot.slane %v1059_v14, 1  ;;  %v1132_v23 = vmul.f32 %v3123_v44, %v3123_v44 }
 0x1ab   : > { %v1043_v24 = vadd.f32 %v1042_v16, %v1041_v8  ;;  %v1066_v25 = vrot.slane %v1065_v17, 1  ;;  %v1071_v26 = vadd.f32 %v1070_v18, %v1069_v10  ;;  %v1133_v27 = vmul.f32 %v3125_v45, %v3125_v45 }
 0x1ac   : > { %v1049_v28 = vadd.f32 %v1048_v20, %v1047_v12  ;;  %v1055_v29 = vadd.f32 %v1054_v21, %v1053_v13  ;;  %v1061_v30 = vadd.f32 %v1060_v22, %v1059_v14  ;;  %v1134_v31 = vrot.slane %v1128_v3, 4  ;;  %v1037_v12 = vld [vmem:[#allocation2] sm:$0x3f] }
 0x1ad   : > { %v1067_v32 = vadd.f32 %v1066_v25, %v1065_v17  ;;  %v1072_v33 = vrot.slane %v1071_v26, 1  ;;  %v1140_v34 = vrot.slane %v1129_v11, 4  ;;  %v1146_v35 = vrot.slane %v1130_v15, 4 }
 0x1ae   : > { %v1080_v38 = vcombine.low %v1043_v24, %v1049_v28  ;;  %v1081_v39 = vcombine.low %v1055_v29, %v1061_v30  ;;  %v1135_v42 = vadd.f32 %v1134_v31, %v1128_v3  ;;  %v1152_v43 = vrot.slane %v1131_v19, 4 }
 0x1af   : > { %v1073_v46 = vadd.f32 %v1072_v33, %v1071_v26  ;;  %v1141_v47 = vadd.f32 %v1140_v34, %v1129_v11  ;;  %v1147_v48 = vadd.f32 %v1146_v35, %v1130_v15  ;;  %v1158_v49 = vrot.slane %v1132_v23, 4  ;;  %v1127_v35 = vld [vmem:[#allocation3] sm:$0x3f] }
 0x1b0   : > { %v1089_v50 = vrot.slane %v1080_v38, %v3149_v4  ;;  %v1096_v51 = vrot.slane %v1081_v39, %v3149_v4  ;;  %v1136_v52 = vrot.slane %v1135_v42, 2  ;;  %v1153_v53 = vadd.f32 %v1152_v43, %v1131_v19 }
 0x1b1   : > { %v1082_v54 = vcombine.low %v1067_v32, %v1073_v46  ;;  %v1142_v56 = vrot.slane %v1141_v47, 2  ;;  %v1148_v57 = vrot.slane %v1147_v48, 2  ;;  %v1159_v58 = vadd.f32 %v1158_v49, %v1132_v23 }
 0x1b2   : > { %v1104_v59 = vcombine.low %v1089_v50, %v1096_v51  ;;  %v1137_v60 = vadd.f32 %v1136_v52, %v1135_v42  ;;  %v1154_v61 = vrot.slane %v1153_v53, 2  ;;  %v1164_v62 = vrot.slane %v1133_v27, 4  ;;  %v1228_v51 = vld [vmem:[#allocation11] sm:$0x3f] }
 0x1b3   : > { %v1103_v63 = vrot.slane %v1082_v54, %v3149_v4  ;;  %v1143_v0 = vadd.f32 %v1142_v56, %v1141_v47  ;;  %v1149_v1 = vadd.f32 %v1148_v57, %v1147_v48  ;;  %v1160_v2 = vrot.slane %v1159_v58, 2 }
 0x1b4   : > { %v1111_v3 = vrot.slane %v1104_v59, %v3149_v4  ;;  %v1138_v5 = vrot.slane %v1137_v60, 1  ;;  %v1155_v6 = vadd.f32 %v1154_v61, %v1153_v53  ;;  %v1165_v7 = vadd.f32 %v1164_v62, %v1133_v27 }
 0x1b5   : > { %v1118_v8 = vrot.slane %v1103_v63, %v3149_v4  ;;  %v1144_v9 = vrot.slane %v1143_v0, 1  ;;  %v1150_v10 = vrot.slane %v1149_v1, 1  ;;  %v1161_v11 = vadd.f32 %v1160_v2, %v1159_v58 }
 0x1b6   : > { %v1139_v13 = vadd.f32 %v1138_v5, %v1137_v60  ;;  %v1156_v14 = vrot.slane %v1155_v6, 1  ;;  %v1166_v15 = vrot.slane %v1165_v7, 2 }
 0x1b7   : > { %v1119_v16 = vcombine.low %v1111_v3, %v1118_v8  ;;  %v1145_v17 = vadd.f32 %v1144_v9, %v1143_v0  ;;  %v1151_v18 = vadd.f32 %v1150_v10, %v1149_v1  ;;  %v1162_v19 = vrot.slane %v1161_v11, 1 }
 0x1b8   : > { %v1157_v20 = vadd.f32 %v1156_v14, %v1155_v6  ;;  %v1167_v21 = vadd.f32 %v1166_v15, %v1165_v7 }
 0x1b9   : > { %v1121_v22 = vadd.f32 %v1119_v16, %v1037_v12  ;;  %v1176_v23 = vcombine.low %v1139_v13, %v1145_v17  ;;  %v1163_v24 = vadd.f32 %v1162_v19, %v1161_v11 }
 0x1ba   : > { %v1168_v25 = vrot.slane %v1167_v21, 1  ;;  %v1177_v26 = vcombine.low %v1151_v18, %v1157_v20 }
 0x1bb   : > { %1126 = vst.msk [vmem:[#allocation2] sm:$0x3f] %vm3132_vm0, %v1121_v22  ;;  %v1185_v27 = vrot.slane %v1176_v23, %v3149_v4 }
 0x1bc   : > { %v1169_v28 = vadd.f32 %v1168_v25, %v1167_v21  ;;  %v1192_v29 = vrot.slane %v1177_v26, %v3149_v4 }
 0x1be   : > { %v1178_v30 = vcombine.low %v1163_v24, %v1169_v28  ;;  %v1200_v31 = vcombine.low %v1185_v27, %v1192_v29 }
 0x1c0   : > { %v1199_v32 = vrot.slane %v1178_v30, %v3149_v4  ;;  %v1207_v33 = vrot.slane %v1200_v31, %v3149_v4 }
 0x1c2   : > { %v1214_v34 = vrot.slane %v1199_v32, %v3149_v4  ;;  %v1222_v42 = vld [vmem:[#allocation2] sm:$0x3f]  ;;  %v1233_v4 = vld [vmem:[#allocation12] sm:$0x3f] }
 0x1c3   : > { %v1223_v43 = vmul.f32 0.125, %v1222_v42 }
 0x1c4   : > { %v1215_v38 = vcombine.low %v1207_v33, %v1214_v34 }
 0x1c5   : > { %v1226_v46 = vmul.f32 %v1223_v43, %v1223_v43 }
 0x1c6   : > { %v1217_v39 = vadd.f32 %v1215_v38, %v1127_v35 }
 0x1c8   : > { %1218 = vst.msk [vmem:[#allocation3] sm:$0x3f] %vm3132_vm0, %v1217_v39 }
 0x1cf   : > { %v1224_v47 = vld [vmem:[#allocation3] sm:$0x3f] }
 0x1d0   : > { %v1225_v48 = vmul.f32 0.125, %v1224_v47 }
 0x1d2   : > { %v1227_v49 = vsub.f32 %v1225_v48, %v1226_v46 }
 0x1d4   : > { %v1229_v50 = vadd.f32 1e-05, %v1227_v49 }
 0x1d6   : > { %2621 = vrsqrt.f32 %v1229_v50 }
 0x1e3   : > { %v2622_v52 = vpop.eup %2621 }
 0x1e4   : > { %v1231_v53 = vmul.f32 %v2622_v52, %v1228_v51 }
 0x1e6   : > { %1232 = vst.msk [vmem:[#allocation4] sm:$0x3f] %vm3132_vm0, %v1231_v53 }
 0x1ed   : > { %v1234_v54 = vld [vmem:[#allocation4] sm:$0x3f] }
 0x1ee   : > { %v1235_v56 = vmul.f32 %v1234_v54, %v1223_v43 }
 0x1f0   : > { %v1236_v57 = vsub.f32 %v1233_v4, %v1235_v56 }
 0x1f2   : > { %1237 = vst.msk [vmem:[#allocation5] sm:$0x3f] %vm3132_vm0, %v1236_v57 }
 0x1f3 PF: > { %p2283_p5 = scmp.ne.s32.totalorder %s2953_s21, 1 }
 0x1f5   : > { %1241 = sbr.rel (%p2283_p5) target bundleno = 991 (0x3df), region = 80 }
 0x1fa   : > { %v2623_v58 = vld [vmem:[#allocation14 + $0x74] ss:$8 sps:$4 sm:$0xff]   ;;  %v2625_v59 = vld [vmem:[#allocation14 + $0x70] ss:$8 sps:$4 sm:$0xff]   ;;  %v2629_v62 = vld [vmem:[#allocation14 + $0x64] ss:$8 sps:$4 sm:$0xff]   ;;  %v1244_v29 = vlaneseq }
 0x1fb   : > { %1918 = vmatprep.subr.bf16.mxu0 %v2623_v58  ;;  %v2626_v60 = vld [vmem:[#allocation14 + $0x174] ss:$8 sps:$4 sm:$0xff]   ;;  %v2628_v61 = vld [vmem:[#allocation14 + $0x170] ss:$8 sps:$4 sm:$0xff]   ;;  %v2631_v63 = vld [vmem:[#allocation14 + $0x60] ss:$8 sps:$4 sm:$0xff]  }
 0x1fc   : > { %1919 = vmatpush1.bf16.msra.mxu0 %v2625_v59  ;;  %1959 = vmatprep.subr.bf16.mxu1 %v2626_v60  ;;  %v2632_v0 = vld [vmem:[#allocation14 + $0x164] ss:$8 sps:$4 sm:$0xff]   ;;  %v2634_v1 = vld [vmem:[#allocation14 + $0x160] ss:$8 sps:$4 sm:$0xff]   ;;  %v2635_v55 = vld [vmem:[#allocation14 + $0x54] ss:$8 sps:$4 sm:$0xff]  }
 0x1fd   : > { %1960 = vmatpush1.bf16.msra.mxu1 %v2628_v61  ;;  %1920 = vmatprep.subr.bf16.mxu0 %v2629_v62  ;;  %v2637_v2 = vld [vmem:[#allocation14 + $0x50] ss:$8 sps:$4 sm:$0xff]   ;;  %v2638_v3 = vld [vmem:[#allocation14 + $0x154] ss:$8 sps:$4 sm:$0xff]   ;;  %v2641_v5 = vld [vmem:[#allocation14 + $0x44] ss:$8 sps:$4 sm:$0xff]  }
 0x1fe   : > { %1961 = vmatprep.subr.bf16.mxu1 %v2632_v0  ;;  %v2640_v6 = vld [vmem:[#allocation14 + $0x150] ss:$8 sps:$4 sm:$0xff]   ;;  %v2644_v7 = vld [vmem:[#allocation14 + $0x144] ss:$8 sps:$4 sm:$0xff]   ;;  %v2643_v8 = vld [vmem:[#allocation14 + $0x40] ss:$8 sps:$4 sm:$0xff]  }
 0x1ff   : > { %v2647_v9 = vld [vmem:[#allocation14 + $0x34] ss:$8 sps:$4 sm:$0xff]   ;;  %v2646_v10 = vld [vmem:[#allocation14 + $0x140] ss:$8 sps:$4 sm:$0xff]   ;;  %v2649_v12 = vld [vmem:[#allocation14 + $0x30] ss:$8 sps:$4 sm:$0xff]  }
 0x200   : > { %1921 = vmatpush1.bf16.msra.mxu0 %v2631_v63  ;;  %v2650_v11 = vld [vmem:[#allocation14 + $0x134] ss:$8 sps:$4 sm:$0xff]   ;;  %v2653_v13 = vld [vmem:[#allocation14 + $0x24] ss:$8 sps:$4 sm:$0xff]   ;;  %v2652_v14 = vld [vmem:[#allocation14 + $0x130] ss:$8 sps:$4 sm:$0xff]  }
 0x201   : > { %1922 = vmatprep.subr.bf16.mxu0 %v2635_v55  ;;  %1962 = vmatpush1.bf16.msra.mxu1 %v2634_v1  ;;  %v2656_v15 = vld [vmem:[#allocation14 + $0x124] ss:$8 sps:$4 sm:$0xff]   ;;  %v2655_v16 = vld [vmem:[#allocation14 + $0x20] ss:$8 sps:$4 sm:$0xff]   ;;  %v2659_v17 = vld [vmem:[#allocation14 + $0x14] ss:$8 sps:$4 sm:$0xff]  }
 0x202   : > { %1963 = vmatprep.subr.bf16.mxu1 %v2638_v3  ;;  %v2658_v18 = vld [vmem:[#allocation14 + $0x120] ss:$8 sps:$4 sm:$0xff]   ;;  %v2662_v19 = vld [vmem:[#allocation14 + $0x114] ss:$8 sps:$4 sm:$0xff]   ;;  %v2661_v20 = vld [vmem:[#allocation14 + $0x10] ss:$8 sps:$4 sm:$0xff]  }
 0x203   : > { %v2665_v21 = vld [vmem:[#allocation14 + $0x4] ss:$8 sps:$4 sm:$0xff]   ;;  %v2664_v22 = vld [vmem:[#allocation14 + $0x110] ss:$8 sps:$4 sm:$0xff]   ;;  %v2667_v24 = vld [vmem:[#allocation14] ss:$8 sps:$4 sm:$0xff]  }
 0x204   : > { %1923 = vmatpush1.bf16.msra.mxu0 %v2637_v2  ;;  %v2668_v23 = vld [vmem:[#allocation14 + $0x104] ss:$8 sps:$4 sm:$0xff]   ;;  %v2671_v25 = vld [vmem:[#allocation14 + $0xf4] ss:$8 sps:$4 sm:$0xff]   ;;  %v2670_v26 = vld [vmem:[#allocation14 + $0x100] ss:$8 sps:$4 sm:$0xff]  }
 0x205   : > { %1924 = vmatprep.subr.bf16.mxu0 %v2641_v5  ;;  %1964 = vmatpush1.bf16.msra.mxu1 %v2640_v6  ;;  %v2674_v27 = vld [vmem:[#allocation14 + $0x1f4] ss:$8 sps:$4 sm:$0xff]   ;;  %v2673_v28 = vld [vmem:[#allocation14 + $0xf0] ss:$8 sps:$4 sm:$0xff]   ;;  %v2677_v30 = vld [vmem:[#allocation14 + $0xe4] ss:$8 sps:$4 sm:$0xff]  }
 0x206   : > { %1965 = vmatprep.subr.bf16.mxu1 %v2644_v7  ;;  %v2676_v31 = vld [vmem:[#allocation14 + $0x1f0] ss:$8 sps:$4 sm:$0xff]   ;;  %v2680_v32 = vld [vmem:[#allocation14 + $0x1e4] ss:$8 sps:$4 sm:$0xff]   ;;  %v2679_v33 = vld [vmem:[#allocation14 + $0xe0] ss:$8 sps:$4 sm:$0xff]  }
 0x207   : > { %v3181_v34 = vshrl.u32 %v1244_v29, 7  ;;  %v2683_v35 = vld [vmem:[#allocation14 + $0xd4] ss:$8 sps:$4 sm:$0xff]   ;;  %v2682_v38 = vld [vmem:[#allocation14 + $0x1e0] ss:$8 sps:$4 sm:$0xff]  }
 0x208   : > { %1925 = vmatpush1.bf16.msra.mxu0 %v2643_v8  ;;  %v2686_v39 = vld [vmem:[#allocation14 + $0x1d4] ss:$8 sps:$4 sm:$0xff]   ;;  %v2685_v42 = vld [vmem:[#allocation14 + $0xd0] ss:$8 sps:$4 sm:$0xff]   ;;  %v2689_v46 = vld [vmem:[#allocation14 + $0xc4] ss:$8 sps:$4 sm:$0xff]  }
 0x209   : > { %1926 = vmatprep.subr.bf16.mxu0 %v2647_v9  ;;  %1966 = vmatpush1.bf16.msra.mxu1 %v2646_v10  ;;  %v3184_v43 = vsub.s32 1, %v3181_v34  ;;  %v1258_v47 = vsub.s32 3, %v3181_v34  ;;  %v2688_v48 = vld [vmem:[#allocation14 + $0x1d0] ss:$8 sps:$4 sm:$0xff]   ;;  %v3188_v49 = vsub.s32 0, %v3181_v34  ;;  %v1262_v50 = vsub.s32 4, %v3181_v34 }
 0x20a   : > { %1967 = vmatprep.subr.bf16.mxu1 %v2650_v11  ;;  %v2692_v51 = vld [vmem:[#allocation14 + $0x1c4] ss:$8 sps:$4 sm:$0xff]   ;;  %v1242_v52 = vld [vmem:[#allocation4] sm:$0x3f]  ;;  %v1280_v53 = vld [vmem:[#allocation5] sm:$0x3f] }
 0x20b   : > { %v2691_v4 = vld [vmem:[#allocation14 + $0xc0] ss:$8 sps:$4 sm:$0xff]   ;;  %v1251_v54 = vrot.slane %v1242_v52, %v3184_v43  ;;  %v1289_v56 = vrot.slane %v1280_v53, %v3184_v43  ;;  %v1266_v57 = vsub.s32 5, %v3181_v34  ;;  %v2695_v58 = vld [vmem:[#allocation14 + $0xb4] ss:$8 sps:$4 sm:$0xff]   ;;  %v1259_v59 = vrot.slane %v1242_v52, %v1258_v47 }
 0x20c   : > { %1927 = vmatpush1.bf16.msra.mxu0 %v2649_v12  ;;  %v1297_v60 = vrot.slane %v1280_v53, %v1258_v47  ;;  %v1254_v61 = vsub.s32 2, %v3181_v34  ;;  %v2694_v62 = vld [vmem:[#allocation14 + $0x1c0] ss:$8 sps:$4 sm:$0xff]   ;;  %v2698_v0 = vld [vmem:[#allocation14 + $0x1b4] ss:$8 sps:$4 sm:$0xff]   ;;  %v1247_v1 = vrot.slane %v1242_v52, %v3188_v49  ;;  %v1263_v2 = vrot.slane %v1242_v52, %v1262_v50 }
 0x20d   : > { %1928 = vmatprep.subr.bf16.mxu0 %v2653_v13  ;;  %1968 = vmatpush1.bf16.msra.mxu1 %v2652_v14  ;;  %v1275_v63 = vmul.f32 %v1251_v54, %v3117_v37  ;;  %v1277_v55 = vmul.f32 %v1259_v59, %v3121_v41  ;;  %v1301_v3 = vrot.slane %v1280_v53, %v1262_v50  ;;  %v2697_v5 = vld [vmem:[#allocation14 + $0xb0] ss:$8 sps:$4 sm:$0xff]   ;;  %v2701_v8 = vld [vmem:[#allocation14 + $0xa4] ss:$8 sps:$4 sm:$0xff]   ;;  %v2727_v50 = vld [vmem:[#allocation14 + $0x254] ss:$8 sps:$4 sm:$0xff]  }
 0x20e   : > { %1969 = vmatprep.subr.bf16.mxu1 %v2656_v15  ;;  %v1267_v7 = vrot.slane %v1242_v52, %v1266_v57  ;;  %v1255_v10 = vrot.slane %v1242_v52, %v1254_v61  ;;  %v1278_v11 = vmul.f32 %v1263_v2, %v3123_v44  ;;  %v2700_v37 = vld [vmem:[#allocation14 + $0x1b0] ss:$8 sps:$4 sm:$0xff]   ;;  %v2704_v13 = vld [vmem:[#allocation14 + $0x1a4] ss:$8 sps:$4 sm:$0xff]   ;;  %v1274_v14 = vmul.f32 %v1247_v1, %v3115_v36  ;;  %v2707_v44 = vld [vmem:[#allocation14 + $0x94] ss:$8 sps:$4 sm:$0xff]  }
 0x20f   : > { %v1313_v6 = vadd.f32 %v1289_v56, %v1275_v63  ;;  %v1315_v9 = vadd.f32 %v1297_v60, %v1277_v55  ;;  %v1285_v41 = vrot.slane %v1280_v53, %v3188_v49  ;;  %v2710_v36 = vld [vmem:[#allocation14 + $0x194] ss:$8 sps:$4 sm:$0xff]   ;;  %v2712_v29 = vld [vmem:[#allocation14 + $0x190] ss:$8 sps:$4 sm:$0xff]   ;;  %v2724_v47 = vld [vmem:[#allocation14 + $0x264] ss:$8 sps:$4 sm:$0xff]  }
 0x210   : > { %1929 = vmatpush1.bf16.msra.mxu0 %v2655_v16  ;;  %v3201_v16 = vadd.f32 %v1301_v3, %v1278_v11  ;;  %v2730_v52 = vld [vmem:[#allocation14 + $0x244] ss:$8 sps:$4 sm:$0xff]   ;;  %v2731_v54 = vld [vmem:[#allocation14 + $0x230] ss:$8 sps:$4 sm:$0xff]   ;;  %v2746_v1 = vld [vmem:[#allocation14 + $0x2e0] ss:$8 sps:$4 sm:$0xff]  }
 0x211   : > { %1930 = vmatprep.subr.bf16.mxu0 %v2659_v17  ;;  %1970 = vmatpush1.bf16.msra.mxu1 %v2658_v18  ;;  %v1319_v12 = vmax.f32 %v1313_v6, 0.0  ;;  %v1321_v15 = vmax.f32 %v1315_v9, 0.0  ;;  %v2703_v17 = vld [vmem:[#allocation14 + $0xa0] ss:$8 sps:$4 sm:$0xff]   ;;  %v2736_v56 = vld [vmem:[#allocation14 + $0x224] ss:$8 sps:$4 sm:$0xff]  }
 0x212   : > { %1971 = vmatprep.subr.bf16.mxu1 %v2662_v19  ;;  %v1279_v19 = vmul.f32 %v1267_v7, %v3125_v45  ;;  %v2737_v59 = vld [vmem:[#allocation14 + $0x210] ss:$8 sps:$4 sm:$0xff]   ;;  %v2742_v60 = vld [vmem:[#allocation14 + $0x204] ss:$8 sps:$4 sm:$0xff]   ;;  %v2751_v55 = vld [vmem:[#allocation14 + $0x2d4] ss:$8 sps:$4 sm:$0xff]  }
 0x213   : > { %v1325_v18 = vpack.c.bf16 %v1319_v12, %v1319_v12  ;;  %v2743_v63 = vld [vmem:[#allocation14 + $0x2f0] ss:$8 sps:$4 sm:$0xff]   ;;  %v2754_v3 = vld [vmem:[#allocation14 + $0x2c4] ss:$8 sps:$4 sm:$0xff]   ;;  %v2757_v6 = vld [vmem:[#allocation14 + $0x2b4] ss:$8 sps:$4 sm:$0xff]  }
 0x214   : > { %1931 = vmatpush1.bf16.msra.mxu0 %v2661_v20  ;;  %v1305_v20 = vrot.slane %v1280_v53, %v1266_v57  ;;  %v2734_v57 = vld [vmem:[#allocation14 + $0x220] ss:$8 sps:$4 sm:$0xff]   ;;  %v2749_v2 = vld [vmem:[#allocation14 + $0x2d0] ss:$8 sps:$4 sm:$0xff]   ;;  %v1322_v12 = vmax.f32 %v3201_v16, 0.0 }
 0x215   : > { %1932 = vmatprep.subr.bf16.mxu0 %v2665_v21  ;;  %1972 = vmatpush1.bf16.msra.mxu1 %v2664_v22  ;;  %v1327_v21 = vpack.c.bf16 %v1321_v15, %v1321_v15  ;;  %v1276_v22 = vmul.f32 %v1255_v10, %v3119_v40  ;;  %v2715_v40 = vld [vmem:[#allocation14 + $0x80] ss:$8 sps:$4 sm:$0xff]   ;;  %v2755_v7 = vld [vmem:[#allocation14 + $0x2b0] ss:$8 sps:$4 sm:$0xff]   ;;  %v2763_v10 = vld [vmem:[#allocation14 + $0x294] ss:$8 sps:$4 sm:$0xff]  }
 0x216   : > { %1973 = vmatprep.subr.bf16.mxu1 %v2668_v23  ;;  %v1293_v23 = vrot.slane %v1280_v53, %v1254_v61  ;;  %1950 = vmatprep.mubr.bf16.mxu0 %v1325_v18  ;;  %v2728_v53 = vld [vmem:[#allocation14 + $0x240] ss:$8 sps:$4 sm:$0xff]   ;;  %v2761_v11 = vld [vmem:[#allocation14 + $0x290] ss:$8 sps:$4 sm:$0xff]  }
 0x217   : > { %1991 = vmatprep.mubr.bf16.mxu1 %v1327_v21  ;;  %v2740_v61 = vld [vmem:[#allocation14 + $0x200] ss:$8 sps:$4 sm:$0xff]  }
 0x218   : > { %1933 = vmatpush1.bf16.msra.mxu0 %v2667_v24  ;;  %v2706_v24 = vld [vmem:[#allocation14 + $0x1a0] ss:$8 sps:$4 sm:$0xff]   ;;  %v1314_v45 = vadd.f32 %v1293_v23, %v1276_v22  ;;  %v1426_v22 = vld [vmem:[%s3241_s5] sm:$0x3] }
 0x219   : > { %1934 = vmatprep.subr.bf16.mxu0 %v2671_v25  ;;  %1974 = vmatpush1.bf16.msra.mxu1 %v2670_v26  ;;  %v1312_v25 = vadd.f32 %v1285_v41, %v1274_v14  ;;  %v2709_v26 = vld [vmem:[#allocation14 + $0x90] ss:$8 sps:$4 sm:$0xff]   ;;  %v2758_v9 = vld [vmem:[#allocation14 + $0x2a0] ss:$8 sps:$4 sm:$0xff]   ;;  %v1328_v14 = vpack.c.bf16 %v1322_v12, %v1322_v12  ;;  %v1431_v16 = vrot.slane %v1426_v22, %v3188_v49 }
 0x21a   : > { %1975 = vmatprep.subr.bf16.mxu1 %v2674_v27  ;;  %v1317_v27 = vadd.f32 %v1305_v20, %v1279_v19  ;;  %v1320_v34 = vmax.f32 %v1314_v45, 0.0  ;;  %v1435_v23 = vrot.slane %v1426_v22, %v3184_v43 }
 0x21c   : > { %1935 = vmatpush2.bf16.msra.mxu0 %v2673_v28  ;;  %v2713_v28 = vld [vmem:[#allocation14 + $0x84] ss:$8 sps:$4 sm:$0xff]  }
 0x21d   : > { %1936 = vmatprep.subr.bf16.mxu0 %v2677_v30  ;;  %1976 = vmatpush2.bf16.msra.mxu1 %v2676_v31  ;;  %v2716_v30 = vld [vmem:[#allocation14 + $0x184] ss:$8 sps:$4 sm:$0xff]   ;;  %v1318_v31 = vmax.f32 %v1312_v25, 0.0 }
 0x21e   : > { %1977 = vmatprep.subr.bf16.mxu1 %v2680_v32  ;;  %v1323_v32 = vmax.f32 %v1317_v27, 0.0 }
 0x220   : > { %1937 = vmatpush2.bf16.msra.mxu0 %v2679_v33  ;;  %v2721_v33 = vld [vmem:[#allocation14 + $0x274] ss:$8 sps:$4 sm:$0xff]  }
 0x221   : > { %1938 = vmatprep.subr.bf16.mxu0 %v2683_v35  ;;  %1978 = vmatpush2.bf16.msra.mxu1 %v2682_v38  ;;  %v2718_v35 = vld [vmem:[#allocation14 + $0x180] ss:$8 sps:$4 sm:$0xff]   ;;  %v1324_v38 = vpack.c.bf16 %v1318_v31, %v1318_v31 }
 0x222   : > { %1979 = vmatprep.subr.bf16.mxu1 %v2686_v39  ;;  %v2719_v39 = vld [vmem:[#allocation14 + $0x270] ss:$8 sps:$4 sm:$0xff]  }
 0x224   : > { %1939 = vmatpush2.bf16.msra.mxu0 %v2685_v42  ;;  %v1329_v42 = vpack.c.bf16 %v1323_v32, %v1323_v32 }
 0x225   : > { %1940 = vmatprep.subr.bf16.mxu0 %v2689_v46  ;;  %1980 = vmatpush2.bf16.msra.mxu1 %v2688_v48  ;;  %v1326_v46 = vpack.c.bf16 %v1320_v34, %v1320_v34  ;;  %v2722_v48 = vld [vmem:[#allocation14 + $0x260] ss:$8 sps:$4 sm:$0xff]  }
 0x226   : > { %1981 = vmatprep.subr.bf16.mxu1 %v2692_v51  ;;  %v2725_v51 = vld [vmem:[#allocation14 + $0x250] ss:$8 sps:$4 sm:$0xff]  }
 0x228   : > { %1941 = vmatpush2.bf16.msra.mxu0 %v2691_v4  ;;  %v2733_v4 = vld [vmem:[#allocation14 + $0x234] ss:$8 sps:$4 sm:$0xff]  }
 0x229   : > { %1942 = vmatprep.subr.bf16.mxu0 %v2695_v58  ;;  %1982 = vmatpush2.bf16.msra.mxu1 %v2694_v62  ;;  %v2739_v58 = vld [vmem:[#allocation14 + $0x214] ss:$8 sps:$4 sm:$0xff]  }
 0x22a   : > { %1983 = vmatprep.subr.bf16.mxu1 %v2698_v0  ;;  %v2745_v62 = vld [vmem:[#allocation14 + $0x2f4] ss:$8 sps:$4 sm:$0xff]   ;;  %v2748_v0 = vld [vmem:[#allocation14 + $0x2e4] ss:$8 sps:$4 sm:$0xff]  }
 0x22c   : > { %1943 = vmatpush2.bf16.msra.mxu0 %v2697_v5  ;;  %v2752_v5 = vld [vmem:[#allocation14 + $0x2c0] ss:$8 sps:$4 sm:$0xff]  }
 0x22d   : > { %1944 = vmatprep.subr.bf16.mxu0 %v2701_v8  ;;  %1984 = vmatpush2.bf16.msra.mxu1 %v2700_v37  ;;  %v2760_v8 = vld [vmem:[#allocation14 + $0x2a4] ss:$8 sps:$4 sm:$0xff]  }
 0x22e   : > { %1985 = vmatprep.subr.bf16.mxu1 %v2704_v13  ;;  %v2766_v37 = vld [vmem:[#allocation14 + $0x284] ss:$8 sps:$4 sm:$0xff]   ;;  %v2764_v13 = vld [vmem:[#allocation14 + $0x280] ss:$8 sps:$4 sm:$0xff]  }
 0x230   : > { %1945 = vmatpush2.bf16.msra.mxu0 %v2703_v17 }
 0x231   : > { %1946 = vmatprep.subr.bf16.mxu0 %v2707_v44  ;;  %1986 = vmatpush2.bf16.msra.mxu1 %v2706_v24 }
 0x232   : > { %1987 = vmatprep.subr.bf16.mxu1 %v2710_v36 }
 0x234   : > { %1947 = vmatpush2.bf16.msra.mxu0 %v2709_v26 }
 0x235   : > { %1948 = vmatprep.subr.bf16.mxu0 %v2713_v28  ;;  %1988 = vmatpush2.bf16.msra.mxu1 %v2712_v29 }
 0x236   : > { %1989 = vmatprep.subr.bf16.mxu1 %v2716_v30 }
 0x238   : > { %1949 = vmatpush2.bf16.msra.mxu0 %v2715_v40 }
 0x239   : > { %2000 = vmatprep.subr.bf16.mxu0 %v2721_v33  ;;  %1990 = vmatpush2.bf16.msra.mxu1 %v2718_v35 }
 0x23b   : > { %1951 = vmatmul.mubr.bf16.vlgmr.msra.gmra.mxu0 %v1324_v38 }
 0x23c   : > { %2001 = vmatpush1.bf16.msra.mxu0 %v2719_v39  ;;  %2032 = vmatprep.mubr.bf16.mxu0 %v1329_v42 }
 0x23d   : > { %1992 = vmatmul.mubr.bf16.vlgmr.msra.gmra.mxu1 %v1326_v46  ;;  %2002 = vmatprep.subr.bf16.mxu0 %v2724_v47 }
 0x240   : > { %2003 = vmatpush1.bf16.msra.mxu0 %v2722_v48 }
 0x241   : > { %2004 = vmatprep.subr.bf16.mxu0 %v2727_v50 }
 0x244   : > { %2005 = vmatpush1.bf16.msra.mxu0 %v2725_v51 }
 0x245   : > { %2006 = vmatprep.subr.bf16.mxu0 %v2730_v52 }
 0x248   : > { %2007 = vmatpush1.bf16.msra.mxu0 %v2728_v53 }
 0x249   : > { %2008 = vmatprep.subr.bf16.mxu0 %v2733_v4 }
 0x24c   : > { %2009 = vmatpush1.bf16.msra.mxu0 %v2731_v54 }
 0x24d   : > { %2010 = vmatprep.subr.bf16.mxu0 %v2736_v56 }
 0x250   : > { %2011 = vmatpush1.bf16.msra.mxu0 %v2734_v57 }
 0x251   : > { %2012 = vmatprep.subr.bf16.mxu0 %v2739_v58 }
 0x254   : > { %2013 = vmatpush1.bf16.msra.mxu0 %v2737_v59 }
 0x255   : > { %2014 = vmatprep.subr.bf16.mxu0 %v2742_v60 }
 0x258   : > { %2015 = vmatpush1.bf16.msra.mxu0 %v2740_v61 }
 0x259   : > { %2016 = vmatprep.subr.bf16.mxu0 %v2745_v62 }
 0x25c   : > { %2017 = vmatpush2.bf16.msra.mxu0 %v2743_v63 }
 0x25d   : > { %2018 = vmatprep.subr.bf16.mxu0 %v2748_v0 }
 0x260   : > { %2019 = vmatpush2.bf16.msra.mxu0 %v2746_v1 }
 0x261   : > { %2020 = vmatprep.subr.bf16.mxu0 %v2751_v55 }
 0x264   : > { %2021 = vmatpush2.bf16.msra.mxu0 %v2749_v2 }
 0x265   : > { %2022 = vmatprep.subr.bf16.mxu0 %v2754_v3 }
 0x268   : > { %2023 = vmatpush2.bf16.msra.mxu0 %v2752_v5 }
 0x269   : > { %2024 = vmatprep.subr.bf16.mxu0 %v2757_v6 }
 0x26c   : > { %2025 = vmatpush2.bf16.msra.mxu0 %v2755_v7 }
 0x26d   : > { %2026 = vmatprep.subr.bf16.mxu0 %v2760_v8 }
 0x270   : > { %2027 = vmatpush2.bf16.msra.mxu0 %v2758_v9 }
 0x271   : > { %2028 = vmatprep.subr.bf16.mxu0 %v2763_v10 }
 0x274   : > { %2029 = vmatpush2.bf16.msra.mxu0 %v2761_v11 }
 0x275   : > { %2030 = vmatprep.subr.bf16.mxu0 %v2766_v37 }
 0x278   : > { %2031 = vmatpush2.bf16.msra.mxu0 %v2764_v13 }
 0x27b   : > { %2033 = vmatmul.mubr.bf16.vlgmr.msra.gmra.mxu0 %v1328_v14 }
 0x2fb   : > { %v1952_v41 = vpop.f32.mrf.mxu0 }
 0x2fc   : > { %v1953_v24 = vadd.f32 %v1952_v41, %v1431_v16 }
 0x2fd   : > { %v1954_v15 = vpop.f32.mrf.mxu0  ;;  %v1993_v17 = vpop.f32.mrf.mxu1 }
 0x2fe   : > { %v1955_v36 = vadd.f32 %v1954_v15, %v1435_v23  ;;  %v1994_v25 = vadd.f32 %v1993_v17, %v1953_v24 }
 0x2ff   : > { %v1956_v18 = vpop.f32.mrf.mxu0  ;;  %v1995_v19 = vpop.f32.mrf.mxu1 }
 0x300   : > { %v1996_v27 = vadd.f32 %v1995_v19, %v1955_v36 }
 0x301   : > { %v1957_v20 = vpop.f32.mrf.mxu0  ;;  %v1997_v44 = vpop.f32.mrf.mxu1 }
 0x303   : > { %v1998_v21 = vpop.f32.mrf.mxu1 }
 0x33b   : > { %v2034_v26 = vpop.f32.mrf.mxu0 }
 0x33c   : > { %v2035_v28 = vadd.f32 %v2034_v26, %v1994_v25 }
 0x33d   : > { %v2036_v45 = vpop.f32.mrf.mxu0 }
 0x33e   : > { %2047 = vst [vmem:[#allocation15] sm:$0xff] %v2035_v28  ;;  %v2037_v29 = vadd.f32 %v2036_v45, %v1996_v27 }
 0x33f   : > { %v2038_v30 = vpop.f32.mrf.mxu0 }
 0x340   : > { %v2041_v31 = vmul.f32 %v2037_v29, %v2037_v29 }
 0x341   : > { %v2039_v40 = vpop.f32.mrf.mxu0 }
 0x342   : > { %2042 = vadd.xlane.f32.xlu0 %v2041_v31 }
 0x3cb   : > { %v2043_v32 = vpop.xlane.xlu0 %2042 }
 0x3cc   : > { %v2044_v33 = vmax.f32 %v2043_v32, 1e-24 }
 0x3ce   : > { %2767 = vrsqrt.f32 %v2044_v33 }
 0x3db   : > { %v2768_v34 = vpop.eup %2767 }
 0x3dc   : > { %v2046_v49 = vmul.f32 %v2768_v34, %v2037_v29 }
 0x3de   : > { %2048 = vst [vmem:[#allocation15 + $0x8] sm:$0xff] %v2046_v49 }
 0x3df PF: > { %p3213_p6 = scmp.eq.s32.totalorder %s2172_s26, 1  ;;  %s2974_s8 = smov [#allocation15]  }
 0x3e0   : > { %s2065_s9 = sshll.u32 %s2974_s8, 4  ;;  %s2066_s9 = int_to_ptr.vmem [resolvable:$true] %s2065_s9 }
 0x3e1   : > { %s2899_s25 = scalar_lea.vmem %s2066_s9, 256  ;;  %s2905_s30 = scalar_lea.vmem %s2066_s9, 512 }
 0x3e2   : > { %p2900_p11 = scmp.ne.s32.totalorder %s2066_s9, %s2899_s25  ;;  %p2906_p13 = scmp.lt.s32.totalorder %s2066_s9, %s2066_s9 }
 0x3e3   : > { %p2907_p0 = scmp.lt.s32.totalorder %s2905_s30, %s2899_s25 }
 0x3e4   : > { %p2901_p2 = pnand %p2900_p11, %p3213_p6 }
 0x3e5   : > { %p2908_p1 = por %p2907_p0, %p2906_p13 }
 0x3e6   : > { %p2902_p12 = pneg %p2901_p2 }
 0x3e8   : > { %p2909_p4 = pnand %p2908_p1, %p2902_p12 }
 0x3ea   : > { %2912 = shalt.err (!%p2909_p4)
}
 0x3eb   : > { %2405 = dma.vmem_to_hbm [thread:$0]  (%p3213_p6), %s2066_s9, 256, %s3242_s6, [#allocation8]  }
 0x3ec PF: > { %p2439_p7 = scmp.ge.s32.totalorder %s2961_s23, 2  ;;  %p2440_p8 = scmp.eq.s32.totalorder %s2173_s27, 1 }
 0x3ee   : > { %p2425_p10 = pnand %p2440_p8, %p2439_p7 }
 0x3f0   : > { %p2426_p9 = pneg %p2425_p10 }
 0x3f2   : > { %2948 = dma.done.wait (%p2426_p9), [#allocation8], 256  }
 0x3f3   : > { %2950 = vsyncadd (%p2426_p9), [#allocation8], 4294967040  ;;  %s22_s23 = sadd.s32 1, %s2961_s23   ;;  %s3255_s21 = smov %s2957_s22 }
 0x3f4   : > { %p19_p3 = scmp.ge.s32.totalorder %s22_s23, 4   ;;  %s3256_s22 = smov %s3258_s18 }
 0x3f6   :  { %21 = sbr.rel (!%p19_p3) target bundleno = 6 (0x6), region = 114 }
 0x3fb   :  { %2083 = vsyncpa [#allocation7], 1 }
 0x3fc   :  { %2085 = vsyncpa [#allocation7 + $0x1], 1 }
 0x3fd   :  { %2086 = vsyncpa [#allocation10], 1 }
 0x3fe   :  { %2087 = vsyncpa [#allocation13], 1 }
 0x3ff   :  { %2088 = vsyncpa [#allocation8], 1 }
 0x400   :  { %2090 = vsyncpa [#allocation8 + $0x1], 1 }

</bundles_post_ra>
